<compile_context>
chip_gen: v6e
topology: v6e:2x2x1
jax: 0.10.0
libtpu: 0.0.40
codegen_flags: <defaults>
</compile_context>

<pallas_src>
import functools

import jax
import jax.numpy as jnp
from jax.experimental import pallas as pl
from jax.experimental.pallas import tpu as pltpu

# -------- small synthetic T5-encoder config --------
VOCAB = 64
D_MODEL = 32           # hidden_size
NUM_HEADS = 4
D_KV = 8               # head dim
D_INNER = NUM_HEADS * D_KV
D_FF = 64
NUM_LAYERS = 2
NUM_BUCKETS = 32
MAX_DISTANCE = 128
NUM_LABELS = 3
PAD_LABELS = 128       # lane-dense padded classifier output width
LN_EPS = 1e-6


# ---------------- fused encoder + head kernel ----------------

def _rms(x, gamma):
    # T5LayerNorm: no mean subtraction, no bias.
    var = jnp.mean(x * x, axis=-1, keepdims=True)
    return x * jax.lax.rsqrt(var + LN_EPS) * gamma


def _encoder_kernel(h0_ref, bias_ref,
                    ln1_ref, wqkv_ref, wo_ref, ln2_ref, wi_ref, woff_ref,
                    lnf_ref, cw1_ref, cb1_ref, cw2_ref, cb2_ref,
                    out_ref, h_scr, *, batch, seq):
    l = pl.program_id(0)

    # Load the embedded input into the resident hidden-state scratch once.
    @pl.when(l == 0)
    def _():
        h_scr[...] = h0_ref[...]

    h = h_scr[...]                                         # (B*S, D_MODEL)

    # ---- self-attention sub-block (pre-RMSNorm, residual; T5: no 1/sqrt(dk)) ----
    hn = _rms(h, ln1_ref[0])                               # (B*S, D_MODEL)
    # fused QKV projection: (B*S, D) @ (D, 3*H*Dh)
    qkv = jnp.dot(hn, wqkv_ref[0], preferred_element_type=jnp.float32)
    wo_full = wo_ref[0]                                    # (H*Dh, D_MODEL)

    attn_proj = jnp.zeros_like(h)
    for hh in range(NUM_HEADS):
        q_h = qkv[:, hh * D_KV:(hh + 1) * D_KV]                            # (BS, Dh)
        k_h = qkv[:, D_INNER + hh * D_KV:D_INNER + (hh + 1) * D_KV]        # (BS, Dh)
        v_h = qkv[:, 2 * D_INNER + hh * D_KV:2 * D_INNER + (hh + 1) * D_KV]
        # scores over all B*S keys; cross-batch / padded keys carry -1e9 in bias.
        s = jax.lax.dot_general(q_h, k_h, (((1,), (1,)), ((), ())),
                                preferred_element_type=jnp.float32)        # (BS, BS)
        s = s + bias_ref[hh]
        s = s - jnp.max(s, axis=-1, keepdims=True)
        p = jnp.exp(s)
        p = p / jnp.sum(p, axis=-1, keepdims=True)
        o_h = jnp.dot(p, v_h, preferred_element_type=jnp.float32)          # (BS, Dh)
        # accumulate the output projection per head (== concat(o_h) @ wo)
        wo_h = wo_full[hh * D_KV:(hh + 1) * D_KV, :]                       # (Dh, D)
        attn_proj = attn_proj + jnp.dot(o_h, wo_h,
                                        preferred_element_type=jnp.float32)
    h = h + attn_proj

    # ---- feed-forward sub-block: wo(relu(wi(x))), residual ----
    hn = _rms(h, ln2_ref[0])
    ff = jnp.maximum(jnp.dot(hn, wi_ref[0], preferred_element_type=jnp.float32),
                     0.0)
    h = h + jnp.dot(ff, woff_ref[0], preferred_element_type=jnp.float32)

    h_scr[...] = h

    # ---- final RMSNorm + classifier head, on the last layer only ----
    @pl.when(l == pl.num_programs(0) - 1)
    def _():
        # classifier consumes only features[:, 0, :]; RMSNorm is per-row, so
        # normalize just those B rows (dropout = identity in eval mode).
        x0 = jnp.concatenate([h[b * seq:b * seq + 1, :] for b in range(batch)],
                             axis=0)                        # (B, D_MODEL)
        x0 = _rms(x0, lnf_ref[...])
        t = jnp.tanh(jnp.dot(x0, cw1_ref[...],
                             preferred_element_type=jnp.float32) + cb1_ref[...])
        out_ref[...] = (jnp.dot(t, cw2_ref[...],
                                preferred_element_type=jnp.float32)
                        + cb2_ref[...])                     # (B, PAD_LABELS)


def _layer_spec(shape):
    nd = len(shape)
    return pl.BlockSpec((1,) + tuple(shape[1:]),
                        lambda l, _nd=nd: (l,) + (0,) * (_nd - 1))


def _full_spec(shape):
    nd = len(shape)
    return pl.BlockSpec(tuple(shape), lambda l, _nd=nd: (0,) * _nd)


# ---------------- plain-JAX glue (gathers / bias precompute) ----------------

def _relative_position_bucket(rel_pos, num_buckets=NUM_BUCKETS,
                              max_distance=MAX_DISTANCE):
    # bidirectional (encoder) bucketing, as in HF T5
    num_buckets //= 2
    ret = (rel_pos > 0).astype(jnp.int32) * num_buckets
    n = jnp.abs(rel_pos)
    max_exact = num_buckets // 2
    is_small = n < max_exact
    val_if_large = max_exact + (
        jnp.log(jnp.maximum(n, 1).astype(jnp.float32) / max_exact)
        / jnp.log(max_distance / max_exact)
        * (num_buckets - max_exact)
    ).astype(jnp.int32)
    val_if_large = jnp.minimum(val_if_large, num_buckets - 1)
    return ret + jnp.where(is_small, n, val_if_large)


def compute_position_bias(rel_emb, seq_len):
    ctx = jnp.arange(seq_len)[:, None]
    mem = jnp.arange(seq_len)[None, :]
    buckets = _relative_position_bucket(mem - ctx)           # (S, S)
    return jnp.take(rel_emb.T, buckets, axis=1)              # (H, S, S), no transpose


def init_params(key):
    k_embed, k_rel, k_cls1, k_cls2, k_layers = jax.random.split(key, 5)

    def norm(k, shape, scale=0.05):
        return jax.random.normal(k, shape, jnp.float32) * scale

    wqkv, wo, wi, woff = [], [], [], []
    lkeys = jax.random.split(k_layers, NUM_LAYERS)
    for i in range(NUM_LAYERS):
        ks = jax.random.split(lkeys[i], 4)
        wqkv.append(norm(ks[0], (D_MODEL, 3 * D_INNER)))      # [Wq | Wk | Wv]
        wo.append(norm(ks[1], (D_INNER, D_MODEL)))
        wi.append(norm(ks[2], (D_MODEL, D_FF)))
        woff.append(norm(ks[3], (D_FF, D_MODEL)))

    cls_w2 = norm(k_cls2, (D_MODEL, NUM_LABELS))
    cls_w2_pad = jnp.zeros((D_MODEL, PAD_LABELS), jnp.float32)
    cls_w2_pad = cls_w2_pad.at[:, :NUM_LABELS].set(cls_w2)

    return {
        'embed': norm(k_embed, (VOCAB, D_MODEL)),
        'rel_emb': norm(k_rel, (NUM_BUCKETS, NUM_HEADS)),
        'ln1': jnp.ones((NUM_LAYERS, 1, D_MODEL), jnp.float32),
        'ln2': jnp.ones((NUM_LAYERS, 1, D_MODEL), jnp.float32),
        'wqkv': jnp.stack(wqkv),                              # (L, D, 3*H*Dh)
        'wo': jnp.stack(wo),                                  # (L, H*Dh, D)
        'wi': jnp.stack(wi),                                  # (L, D, D_FF)
        'wo_ff': jnp.stack(woff),                             # (L, D_FF, D)
        'ln_f': jnp.ones((1, D_MODEL), jnp.float32),
        'cls_w1': norm(k_cls1, (D_MODEL, D_MODEL)),
        'cls_b1': jnp.zeros((1, D_MODEL), jnp.float32),
        'cls_w2': cls_w2_pad,                                 # (D, 128) padded
        'cls_b2': jnp.zeros((1, PAD_LABELS), jnp.float32),
    }


def custom_model_forward(params, input_ids, attention_mask):
    B, S = input_ids.shape
    BS = B * S

    # embedding gather (glue)
    h0 = params['embed'][input_ids].reshape(BS, D_MODEL)

    # relative position bias + additive mask, block-diagonal over the flattened
    # (B*S) token axis so attention runs on flat lane-dense activations.
    pos_bias = compute_position_bias(params['rel_emb'], S)    # (H, S, S)
    pos_tiled = jnp.tile(pos_bias, (1, B, B))                 # (H, BS, BS)
    row_b = jnp.arange(BS) // S
    same_batch = row_b[:, None] == row_b[None, :]
    key_valid = attention_mask.reshape(BS) > 0
    mask_add = jnp.where(same_batch & key_valid[None, :], 0.0, -1e9)
    attn_bias = (pos_tiled + mask_add[None]).astype(jnp.float32)

    kernel = functools.partial(_encoder_kernel, batch=B, seq=S)

    out_padded = pl.pallas_call(
        kernel,
        out_shape=jax.ShapeDtypeStruct((B, PAD_LABELS), jnp.float32),
        grid=(NUM_LAYERS,),
        in_specs=[
            _full_spec((BS, D_MODEL)),                        # h0
            _full_spec((NUM_HEADS, BS, BS)),                  # attn bias
            _layer_spec((NUM_LAYERS, 1, D_MODEL)),            # ln1
            _layer_spec((NUM_LAYERS, D_MODEL, 3 * D_INNER)),  # wqkv
            _layer_spec((NUM_LAYERS, D_INNER, D_MODEL)),      # wo
            _layer_spec((NUM_LAYERS, 1, D_MODEL)),            # ln2
            _layer_spec((NUM_LAYERS, D_MODEL, D_FF)),         # wi
            _layer_spec((NUM_LAYERS, D_FF, D_MODEL)),         # wo_ff
            _full_spec((1, D_MODEL)),                         # ln_f
            _full_spec((D_MODEL, D_MODEL)),                   # cls_w1
            _full_spec((1, D_MODEL)),                         # cls_b1
            _full_spec((D_MODEL, PAD_LABELS)),                # cls_w2 (padded)
            _full_spec((1, PAD_LABELS)),                      # cls_b2 (padded)
        ],
        out_specs=pl.BlockSpec((B, PAD_LABELS), lambda l: (0, 0)),
        scratch_shapes=[pltpu.VMEM((BS, D_MODEL), jnp.float32)],
        compiler_params=pltpu.CompilerParams(
            # layers are a sequential carry over the resident hidden state
            dimension_semantics=("arbitrary",)),
    )(h0, attn_bias,
      params['ln1'], params['wqkv'], params['wo'],
      params['ln2'], params['wi'], params['wo_ff'],
      params['ln_f'], params['cls_w1'], params['cls_b1'],
      params['cls_w2'], params['cls_b2'])

    return out_padded[:, :NUM_LABELS]


if __name__ == "__main__":
    key = jax.random.PRNGKey(0)
    pkey, ikey = jax.random.split(key)
    params = init_params(pkey)

    B, S = 2, 8
    input_ids = jax.random.randint(ikey, (B, S), 0, VOCAB, dtype=jnp.int32)
    attention_mask = jnp.array([[1, 1, 1, 1, 1, 1, 1, 1],
                                [1, 1, 1, 1, 1, 0, 0, 0]], dtype=jnp.int32)

    logits = jax.jit(custom_model_forward)(params, input_ids, attention_mask)
    jax.block_until_ready(logits)
    assert logits.shape == (B, NUM_LABELS)
    print("KERNEL_OK")
</pallas_src>

<mosaic_0001>
module attributes {stable_mosaic.version = 11 : i64} {
  func.func @_encoder_kernel(%arg0: i32, %arg1: memref<16x32xf32, #tpu.memory_space<vmem>>, %arg2: memref<4x16x16xf32, #tpu.memory_space<vmem>>, %arg3: memref<1x1x32xf32, #tpu.memory_space<vmem>>, %arg4: memref<1x32x96xf32, #tpu.memory_space<vmem>>, %arg5: memref<1x32x32xf32, #tpu.memory_space<vmem>>, %arg6: memref<1x1x32xf32, #tpu.memory_space<vmem>>, %arg7: memref<1x32x64xf32, #tpu.memory_space<vmem>>, %arg8: memref<1x64x32xf32, #tpu.memory_space<vmem>>, %arg9: memref<1x32xf32, #tpu.memory_space<vmem>>, %arg10: memref<32x32xf32, #tpu.memory_space<vmem>>, %arg11: memref<1x32xf32, #tpu.memory_space<vmem>>, %arg12: memref<32x128xf32, #tpu.memory_space<vmem>>, %arg13: memref<1x128xf32, #tpu.memory_space<vmem>>, %arg14: memref<2x128xf32, #tpu.memory_space<vmem>>, %arg15: memref<16x32xf32, #tpu.memory_space<vmem>>) attributes {dimension_semantics = [#tpu.dimension_semantics<arbitrary>], iteration_bounds = array<i64: 2>, scalar_prefetch = 0 : i64, scratch_operands = 1 : i64, tpu.core_type = #tpu.core_type<tc>, window_params = [{pipeline_mode = #tpu.pipeline_mode<synchronous>, transform_indices = @transform_0, window_bounds = array<i64: 16, 32>}, {pipeline_mode = #tpu.pipeline_mode<synchronous>, transform_indices = @transform_1, window_bounds = array<i64: 4, 16, 16>}, {transform_indices = @transform_2, window_bounds = array<i64: 1, 1, 32>}, {transform_indices = @transform_3, window_bounds = array<i64: 1, 32, 96>}, {transform_indices = @transform_4, window_bounds = array<i64: 1, 32, 32>}, {transform_indices = @transform_5, window_bounds = array<i64: 1, 1, 32>}, {transform_indices = @transform_6, window_bounds = array<i64: 1, 32, 64>}, {transform_indices = @transform_7, window_bounds = array<i64: 1, 64, 32>}, {pipeline_mode = #tpu.pipeline_mode<synchronous>, transform_indices = @transform_8, window_bounds = array<i64: 1, 32>}, {pipeline_mode = #tpu.pipeline_mode<synchronous>, transform_indices = @transform_9, window_bounds = array<i64: 32, 32>}, {pipeline_mode = #tpu.pipeline_mode<synchronous>, transform_indices = @transform_10, window_bounds = array<i64: 1, 32>}, {pipeline_mode = #tpu.pipeline_mode<synchronous>, transform_indices = @transform_11, window_bounds = array<i64: 32, 128>}, {pipeline_mode = #tpu.pipeline_mode<synchronous>, transform_indices = @transform_12, window_bounds = array<i64: 1, 128>}, {pipeline_mode = #tpu.pipeline_mode<synchronous>, transform_indices = @transform_13, window_bounds = array<i64: 2, 128>}]} {
    %c0_i32 = arith.constant 0 : i32
    %0 = arith.cmpi eq, %arg0, %c0_i32 : i32
    %1 = arith.extui %0 : i1 to i32
    %c0_i32_0 = arith.constant 0 : i32
    %2 = arith.cmpi ne, %1, %c0_i32_0 : i32
    scf.if %2 {
      %c0_62 = arith.constant 0 : index
      %c0_63 = arith.constant 0 : index
      %132 = vector.load %arg1[%c0_62, %c0_63] : memref<16x32xf32, #tpu.memory_space<vmem>>, vector<16x32xf32>
      %c0_64 = arith.constant 0 : index
      %c0_65 = arith.constant 0 : index
      %133 = vector.load %arg15[%c0_64, %c0_65] : memref<16x32xf32, #tpu.memory_space<vmem>>, vector<16x32xf32>
      tpu.vector_store %arg15[%c0_64, %c0_65], %132 {strides = array<i32>} : memref<16x32xf32, #tpu.memory_space<vmem>>, vector<16x32xf32>,
    } else {
    }
    %c0 = arith.constant 0 : index
    %c0_1 = arith.constant 0 : index
    %3 = vector.load %arg15[%c0, %c0_1] : memref<16x32xf32, #tpu.memory_space<vmem>>, vector<16x32xf32>
    %c0_2 = arith.constant 0 : index
    %c0_3 = arith.constant 0 : index
    %c0_4 = arith.constant 0 : index
    %4 = vector.load %arg3[%c0_2, %c0_3, %c0_4] : memref<1x1x32xf32, #tpu.memory_space<vmem>>, vector<1x1x32xf32>
    %5 = vector.shape_cast %4 : vector<1x1x32xf32> to vector<1x32xf32>
    %6 = arith.mulf %3, %3 : vector<16x32xf32>
    %cst = arith.constant dense<0.000000e+00> : vector<16xf32>
    %7 = vector.multi_reduction <add>, %6, %cst [1] : vector<16x32xf32> to vector<16xf32>
    %8 = vector.shape_cast %7 : vector<16xf32> to vector<16x1xf32>
    %cst_5 = arith.constant 3.200000e+01 : f32
    %9 = vector.broadcast %cst_5 : f32 to vector<16x1xf32>
    %10 = arith.divf %8, %9 : vector<16x1xf32>
    %cst_6 = arith.constant 9.99999997E-7 : f32
    %11 = vector.broadcast %cst_6 : f32 to vector<16x1xf32>
    %12 = arith.addf %10, %11 : vector<16x1xf32>
    %13 = math.rsqrt %12 : vector<16x1xf32>
    %14 = vector.broadcast %13 : vector<16x1xf32> to vector<16x32xf32>
    %15 = arith.mulf %3, %14 : vector<16x32xf32>
    %16 = vector.broadcast %5 : vector<1x32xf32> to vector<16x32xf32>
    %17 = arith.mulf %15, %16 : vector<16x32xf32>
    %c0_7 = arith.constant 0 : index
    %c0_8 = arith.constant 0 : index
    %c0_9 = arith.constant 0 : index
    %18 = vector.load %arg4[%c0_7, %c0_8, %c0_9] : memref<1x32x96xf32, #tpu.memory_space<vmem>>, vector<1x32x96xf32>
    %19 = vector.shape_cast %18 : vector<1x32x96xf32> to vector<32x96xf32>
    %cst_10 = arith.constant dense<0.000000e+00> : vector<16x96xf32>
    %20 = tpu.matmul %17, %19, %cst_10 {dimension_numbers = #tpu.dot_dimension_numbers<[1], [0], [0], [1], [0, 0, 1, 1], [], []>} : vector<16x32xf32>, vector<32x96xf32>, vector<16x96xf32> -> vector<16x96xf32>
    %c0_11 = arith.constant 0 : index
    %c0_12 = arith.constant 0 : index
    %c0_13 = arith.constant 0 : index
    %21 = vector.load %arg5[%c0_11, %c0_12, %c0_13] : memref<1x32x32xf32, #tpu.memory_space<vmem>>, vector<1x32x32xf32>
    %22 = vector.shape_cast %21 : vector<1x32x32xf32> to vector<32x32xf32>
    %cst_14 = arith.constant 0.000000e+00 : f32
    %23 = vector.broadcast %cst_14 : f32 to vector<16x32xf32>
    %24 = vector.extract_strided_slice %20 {offsets = [0, 0], sizes = [16, 8], strides = [1, 1]} : vector<16x96xf32> to vector<16x8xf32>
    %25 = vector.extract_strided_slice %20 {offsets = [0, 32], sizes = [16, 8], strides = [1, 1]} : vector<16x96xf32> to vector<16x8xf32>
    %26 = vector.extract_strided_slice %20 {offsets = [0, 64], sizes = [16, 8], strides = [1, 1]} : vector<16x96xf32> to vector<16x8xf32>
    %cst_15 = arith.constant dense<0.000000e+00> : vector<16x16xf32>
    %27 = tpu.matmul %24, %25, %cst_15 {dimension_numbers = #tpu.dot_dimension_numbers<[1], [1], [0], [0], [0, 0, 1, 0], [], []>} : vector<16x8xf32>, vector<16x8xf32>, vector<16x16xf32> -> vector<16x16xf32>
    %c0_16 = arith.constant 0 : index
    %c0_17 = arith.constant 0 : index
    %c0_18 = arith.constant 0 : index
    %28 = vector.load %arg2[%c0_16, %c0_17, %c0_18] : memref<4x16x16xf32, #tpu.memory_space<vmem>>, vector<1x16x16xf32>
    %29 = vector.shape_cast %28 : vector<1x16x16xf32> to vector<16x16xf32>
    %30 = arith.addf %27, %29 : vector<16x16xf32>
    %cst_19 = arith.constant dense<0xFF800000> : vector<16xf32>
    %31 = vector.multi_reduction <maximumf>, %30, %cst_19 [1] : vector<16x16xf32> to vector<16xf32>
    %32 = vector.shape_cast %31 : vector<16xf32> to vector<16x1xf32>
    %33 = vector.broadcast %32 : vector<16x1xf32> to vector<16x16xf32>
    %34 = arith.subf %30, %33 : vector<16x16xf32>
    %35 = math.exp %34 : vector<16x16xf32>
    %cst_20 = arith.constant dense<0.000000e+00> : vector<16xf32>
    %36 = vector.multi_reduction <add>, %35, %cst_20 [1] : vector<16x16xf32> to vector<16xf32>
    %37 = vector.shape_cast %36 : vector<16xf32> to vector<16x1xf32>
    %38 = vector.broadcast %37 : vector<16x1xf32> to vector<16x16xf32>
    %39 = arith.divf %35, %38 : vector<16x16xf32>
    %cst_21 = arith.constant dense<0.000000e+00> : vector<16x8xf32>
    %40 = tpu.matmul %39, %26, %cst_21 {dimension_numbers = #tpu.dot_dimension_numbers<[1], [0], [0], [1], [0, 0, 1, 1], [], []>} : vector<16x16xf32>, vector<16x8xf32>, vector<16x8xf32> -> vector<16x8xf32>
    %41 = vector.extract_strided_slice %22 {offsets = [0, 0], sizes = [8, 32], strides = [1, 1]} : vector<32x32xf32> to vector<8x32xf32>
    %cst_22 = arith.constant dense<0.000000e+00> : vector<16x32xf32>
    %42 = tpu.matmul %40, %41, %cst_22 {dimension_numbers = #tpu.dot_dimension_numbers<[1], [0], [0], [1], [0, 0, 1, 1], [], []>} : vector<16x8xf32>, vector<8x32xf32>, vector<16x32xf32> -> vector<16x32xf32>
    %43 = arith.addf %23, %42 : vector<16x32xf32>
    %44 = vector.extract_strided_slice %20 {offsets = [0, 8], sizes = [16, 8], strides = [1, 1]} : vector<16x96xf32> to vector<16x8xf32>
    %45 = vector.extract_strided_slice %20 {offsets = [0, 40], sizes = [16, 8], strides = [1, 1]} : vector<16x96xf32> to vector<16x8xf32>
    %46 = vector.extract_strided_slice %20 {offsets = [0, 72], sizes = [16, 8], strides = [1, 1]} : vector<16x96xf32> to vector<16x8xf32>
    %cst_23 = arith.constant dense<0.000000e+00> : vector<16x16xf32>
    %47 = tpu.matmul %44, %45, %cst_23 {dimension_numbers = #tpu.dot_dimension_numbers<[1], [1], [0], [0], [0, 0, 1, 0], [], []>} : vector<16x8xf32>, vector<16x8xf32>, vector<16x16xf32> -> vector<16x16xf32>
    %c1 = arith.constant 1 : index
    %c0_24 = arith.constant 0 : index
    %c0_25 = arith.constant 0 : index
    %48 = vector.load %arg2[%c1, %c0_24, %c0_25] : memref<4x16x16xf32, #tpu.memory_space<vmem>>, vector<1x16x16xf32>
    %49 = vector.shape_cast %48 : vector<1x16x16xf32> to vector<16x16xf32>
    %50 = arith.addf %47, %49 : vector<16x16xf32>
    %cst_26 = arith.constant dense<0xFF800000> : vector<16xf32>
    %51 = vector.multi_reduction <maximumf>, %50, %cst_26 [1] : vector<16x16xf32> to vector<16xf32>
    %52 = vector.shape_cast %51 : vector<16xf32> to vector<16x1xf32>
    %53 = vector.broadcast %52 : vector<16x1xf32> to vector<16x16xf32>
    %54 = arith.subf %50, %53 : vector<16x16xf32>
    %55 = math.exp %54 : vector<16x16xf32>
    %cst_27 = arith.constant dense<0.000000e+00> : vector<16xf32>
    %56 = vector.multi_reduction <add>, %55, %cst_27 [1] : vector<16x16xf32> to vector<16xf32>
    %57 = vector.shape_cast %56 : vector<16xf32> to vector<16x1xf32>
    %58 = vector.broadcast %57 : vector<16x1xf32> to vector<16x16xf32>
    %59 = arith.divf %55, %58 : vector<16x16xf32>
    %cst_28 = arith.constant dense<0.000000e+00> : vector<16x8xf32>
    %60 = tpu.matmul %59, %46, %cst_28 {dimension_numbers = #tpu.dot_dimension_numbers<[1], [0], [0], [1], [0, 0, 1, 1], [], []>} : vector<16x16xf32>, vector<16x8xf32>, vector<16x8xf32> -> vector<16x8xf32>
    %61 = vector.extract_strided_slice %22 {offsets = [8, 0], sizes = [8, 32], strides = [1, 1]} : vector<32x32xf32> to vector<8x32xf32>
    %cst_29 = arith.constant dense<0.000000e+00> : vector<16x32xf32>
    %62 = tpu.matmul %60, %61, %cst_29 {dimension_numbers = #tpu.dot_dimension_numbers<[1], [0], [0], [1], [0, 0, 1, 1], [], []>} : vector<16x8xf32>, vector<8x32xf32>, vector<16x32xf32> -> vector<16x32xf32>
    %63 = arith.addf %43, %62 : vector<16x32xf32>
    %64 = vector.extract_strided_slice %20 {offsets = [0, 16], sizes = [16, 8], strides = [1, 1]} : vector<16x96xf32> to vector<16x8xf32>
    %65 = vector.extract_strided_slice %20 {offsets = [0, 48], sizes = [16, 8], strides = [1, 1]} : vector<16x96xf32> to vector<16x8xf32>
    %66 = vector.extract_strided_slice %20 {offsets = [0, 80], sizes = [16, 8], strides = [1, 1]} : vector<16x96xf32> to vector<16x8xf32>
    %cst_30 = arith.constant dense<0.000000e+00> : vector<16x16xf32>
    %67 = tpu.matmul %64, %65, %cst_30 {dimension_numbers = #tpu.dot_dimension_numbers<[1], [1], [0], [0], [0, 0, 1, 0], [], []>} : vector<16x8xf32>, vector<16x8xf32>, vector<16x16xf32> -> vector<16x16xf32>
    %c2 = arith.constant 2 : index
    %c0_31 = arith.constant 0 : index
    %c0_32 = arith.constant 0 : index
    %68 = vector.load %arg2[%c2, %c0_31, %c0_32] : memref<4x16x16xf32, #tpu.memory_space<vmem>>, vector<1x16x16xf32>
    %69 = vector.shape_cast %68 : vector<1x16x16xf32> to vector<16x16xf32>
    %70 = arith.addf %67, %69 : vector<16x16xf32>
    %cst_33 = arith.constant dense<0xFF800000> : vector<16xf32>
    %71 = vector.multi_reduction <maximumf>, %70, %cst_33 [1] : vector<16x16xf32> to vector<16xf32>
    %72 = vector.shape_cast %71 : vector<16xf32> to vector<16x1xf32>
    %73 = vector.broadcast %72 : vector<16x1xf32> to vector<16x16xf32>
    %74 = arith.subf %70, %73 : vector<16x16xf32>
    %75 = math.exp %74 : vector<16x16xf32>
    %cst_34 = arith.constant dense<0.000000e+00> : vector<16xf32>
    %76 = vector.multi_reduction <add>, %75, %cst_34 [1] : vector<16x16xf32> to vector<16xf32>
    %77 = vector.shape_cast %76 : vector<16xf32> to vector<16x1xf32>
    %78 = vector.broadcast %77 : vector<16x1xf32> to vector<16x16xf32>
    %79 = arith.divf %75, %78 : vector<16x16xf32>
    %cst_35 = arith.constant dense<0.000000e+00> : vector<16x8xf32>
    %80 = tpu.matmul %79, %66, %cst_35 {dimension_numbers = #tpu.dot_dimension_numbers<[1], [0], [0], [1], [0, 0, 1, 1], [], []>} : vector<16x16xf32>, vector<16x8xf32>, vector<16x8xf32> -> vector<16x8xf32>
    %81 = vector.extract_strided_slice %22 {offsets = [16, 0], sizes = [8, 32], strides = [1, 1]} : vector<32x32xf32> to vector<8x32xf32>
    %cst_36 = arith.constant dense<0.000000e+00> : vector<16x32xf32>
    %82 = tpu.matmul %80, %81, %cst_36 {dimension_numbers = #tpu.dot_dimension_numbers<[1], [0], [0], [1], [0, 0, 1, 1], [], []>} : vector<16x8xf32>, vector<8x32xf32>, vector<16x32xf32> -> vector<16x32xf32>
    %83 = arith.addf %63, %82 : vector<16x32xf32>
    %84 = vector.extract_strided_slice %20 {offsets = [0, 24], sizes = [16, 8], strides = [1, 1]} : vector<16x96xf32> to vector<16x8xf32>
    %85 = vector.extract_strided_slice %20 {offsets = [0, 56], sizes = [16, 8], strides = [1, 1]} : vector<16x96xf32> to vector<16x8xf32>
    %86 = vector.extract_strided_slice %20 {offsets = [0, 88], sizes = [16, 8], strides = [1, 1]} : vector<16x96xf32> to vector<16x8xf32>
    %cst_37 = arith.constant dense<0.000000e+00> : vector<16x16xf32>
    %87 = tpu.matmul %84, %85, %cst_37 {dimension_numbers = #tpu.dot_dimension_numbers<[1], [1], [0], [0], [0, 0, 1, 0], [], []>} : vector<16x8xf32>, vector<16x8xf32>, vector<16x16xf32> -> vector<16x16xf32>
    %c3 = arith.constant 3 : index
    %c0_38 = arith.constant 0 : index
    %c0_39 = arith.constant 0 : index
    %88 = vector.load %arg2[%c3, %c0_38, %c0_39] : memref<4x16x16xf32, #tpu.memory_space<vmem>>, vector<1x16x16xf32>
    %89 = vector.shape_cast %88 : vector<1x16x16xf32> to vector<16x16xf32>
    %90 = arith.addf %87, %89 : vector<16x16xf32>
    %cst_40 = arith.constant dense<0xFF800000> : vector<16xf32>
    %91 = vector.multi_reduction <maximumf>, %90, %cst_40 [1] : vector<16x16xf32> to vector<16xf32>
    %92 = vector.shape_cast %91 : vector<16xf32> to vector<16x1xf32>
    %93 = vector.broadcast %92 : vector<16x1xf32> to vector<16x16xf32>
    %94 = arith.subf %90, %93 : vector<16x16xf32>
    %95 = math.exp %94 : vector<16x16xf32>
    %cst_41 = arith.constant dense<0.000000e+00> : vector<16xf32>
    %96 = vector.multi_reduction <add>, %95, %cst_41 [1] : vector<16x16xf32> to vector<16xf32>
    %97 = vector.shape_cast %96 : vector<16xf32> to vector<16x1xf32>
    %98 = vector.broadcast %97 : vector<16x1xf32> to vector<16x16xf32>
    %99 = arith.divf %95, %98 : vector<16x16xf32>
    %cst_42 = arith.constant dense<0.000000e+00> : vector<16x8xf32>
    %100 = tpu.matmul %99, %86, %cst_42 {dimension_numbers = #tpu.dot_dimension_numbers<[1], [0], [0], [1], [0, 0, 1, 1], [], []>} : vector<16x16xf32>, vector<16x8xf32>, vector<16x8xf32> -> vector<16x8xf32>
    %101 = vector.extract_strided_slice %22 {offsets = [24, 0], sizes = [8, 32], strides = [1, 1]} : vector<32x32xf32> to vector<8x32xf32>
    %cst_43 = arith.constant dense<0.000000e+00> : vector<16x32xf32>
    %102 = tpu.matmul %100, %101, %cst_43 {dimension_numbers = #tpu.dot_dimension_numbers<[1], [0], [0], [1], [0, 0, 1, 1], [], []>} : vector<16x8xf32>, vector<8x32xf32>, vector<16x32xf32> -> vector<16x32xf32>
    %103 = arith.addf %83, %102 : vector<16x32xf32>
    %104 = arith.addf %3, %103 : vector<16x32xf32>
    %c0_44 = arith.constant 0 : index
    %c0_45 = arith.constant 0 : index
    %c0_46 = arith.constant 0 : index
    %105 = vector.load %arg6[%c0_44, %c0_45, %c0_46] : memref<1x1x32xf32, #tpu.memory_space<vmem>>, vector<1x1x32xf32>
    %106 = vector.shape_cast %105 : vector<1x1x32xf32> to vector<1x32xf32>
    %107 = arith.mulf %104, %104 : vector<16x32xf32>
    %cst_47 = arith.constant dense<0.000000e+00> : vector<16xf32>
    %108 = vector.multi_reduction <add>, %107, %cst_47 [1] : vector<16x32xf32> to vector<16xf32>
    %109 = vector.shape_cast %108 : vector<16xf32> to vector<16x1xf32>
    %cst_48 = arith.constant 3.200000e+01 : f32
    %110 = vector.broadcast %cst_48 : f32 to vector<16x1xf32>
    %111 = arith.divf %109, %110 : vector<16x1xf32>
    %cst_49 = arith.constant 9.99999997E-7 : f32
    %112 = vector.broadcast %cst_49 : f32 to vector<16x1xf32>
    %113 = arith.addf %111, %112 : vector<16x1xf32>
    %114 = math.rsqrt %113 : vector<16x1xf32>
    %115 = vector.broadcast %114 : vector<16x1xf32> to vector<16x32xf32>
    %116 = arith.mulf %104, %115 : vector<16x32xf32>
    %117 = vector.broadcast %106 : vector<1x32xf32> to vector<16x32xf32>
    %118 = arith.mulf %116, %117 : vector<16x32xf32>
    %c0_50 = arith.constant 0 : index
    %c0_51 = arith.constant 0 : index
    %c0_52 = arith.constant 0 : index
    %119 = vector.load %arg7[%c0_50, %c0_51, %c0_52] : memref<1x32x64xf32, #tpu.memory_space<vmem>>, vector<1x32x64xf32>
    %120 = vector.shape_cast %119 : vector<1x32x64xf32> to vector<32x64xf32>
    %cst_53 = arith.constant dense<0.000000e+00> : vector<16x64xf32>
    %121 = tpu.matmul %118, %120, %cst_53 {dimension_numbers = #tpu.dot_dimension_numbers<[1], [0], [0], [1], [0, 0, 1, 1], [], []>} : vector<16x32xf32>, vector<32x64xf32>, vector<16x64xf32> -> vector<16x64xf32>
    %cst_54 = arith.constant 0.000000e+00 : f32
    %122 = vector.broadcast %cst_54 : f32 to vector<16x64xf32>
    %123 = arith.maximumf %121, %122 : vector<16x64xf32>
    %c0_55 = arith.constant 0 : index
    %c0_56 = arith.constant 0 : index
    %c0_57 = arith.constant 0 : index
    %124 = vector.load %arg8[%c0_55, %c0_56, %c0_57] : memref<1x64x32xf32, #tpu.memory_space<vmem>>, vector<1x64x32xf32>
    %125 = vector.shape_cast %124 : vector<1x64x32xf32> to vector<64x32xf32>
    %cst_58 = arith.constant dense<0.000000e+00> : vector<16x32xf32>
    %126 = tpu.matmul %123, %125, %cst_58 {dimension_numbers = #tpu.dot_dimension_numbers<[1], [0], [0], [1], [0, 0, 1, 1], [], []>} : vector<16x64xf32>, vector<64x32xf32>, vector<16x32xf32> -> vector<16x32xf32>
    %127 = arith.addf %104, %126 : vector<16x32xf32>
    %c0_59 = arith.constant 0 : index
    %c0_60 = arith.constant 0 : index
    %128 = vector.load %arg15[%c0_59, %c0_60] : memref<16x32xf32, #tpu.memory_space<vmem>>, vector<16x32xf32>
    tpu.vector_store %arg15[%c0_59, %c0_60], %127 {strides = array<i32>} : memref<16x32xf32, #tpu.memory_space<vmem>>, vector<16x32xf32>,
    %c1_i32 = arith.constant 1 : i32
    %129 = arith.cmpi eq, %arg0, %c1_i32 : i32
    %130 = arith.extui %129 : i1 to i32
    %c0_i32_61 = arith.constant 0 : i32
    %131 = arith.cmpi ne, %130, %c0_i32_61 : i32
    scf.if %131 {
      %132 = vector.extract_strided_slice %127 {offsets = [0, 0], sizes = [1, 32], strides = [1, 1]} : vector<16x32xf32> to vector<1x32xf32>
      %133 = vector.extract_strided_slice %127 {offsets = [8, 0], sizes = [1, 32], strides = [1, 1]} : vector<16x32xf32> to vector<1x32xf32>
      %134 = tpu.concatenate %132, %133 in 0 : vector<1x32xf32>, vector<1x32xf32> -> vector<2x32xf32>
      %c0_62 = arith.constant 0 : index
      %c0_63 = arith.constant 0 : index
      %135 = vector.load %arg9[%c0_62, %c0_63] : memref<1x32xf32, #tpu.memory_space<vmem>>, vector<1x32xf32>
      %136 = arith.mulf %134, %134 : vector<2x32xf32>
      %cst_64 = arith.constant dense<0.000000e+00> : vector<2xf32>
      %137 = vector.multi_reduction <add>, %136, %cst_64 [1] : vector<2x32xf32> to vector<2xf32>
      %138 = vector.shape_cast %137 : vector<2xf32> to vector<2x1xf32>
      %cst_65 = arith.constant 3.200000e+01 : f32
      %139 = vector.broadcast %cst_65 : f32 to vector<2x1xf32>
      %140 = arith.divf %138, %139 : vector<2x1xf32>
      %cst_66 = arith.constant 9.99999997E-7 : f32
      %141 = vector.broadcast %cst_66 : f32 to vector<2x1xf32>
      %142 = arith.addf %140, %141 : vector<2x1xf32>
      %143 = math.rsqrt %142 : vector<2x1xf32>
      %144 = vector.broadcast %143 : vector<2x1xf32> to vector<2x32xf32>
      %145 = arith.mulf %134, %144 : vector<2x32xf32>
      %146 = vector.broadcast %135 : vector<1x32xf32> to vector<2x32xf32>
      %147 = arith.mulf %145, %146 : vector<2x32xf32>
      %c0_67 = arith.constant 0 : index
      %c0_68 = arith.constant 0 : index
      %148 = vector.load %arg10[%c0_67, %c0_68] : memref<32x32xf32, #tpu.memory_space<vmem>>, vector<32x32xf32>
      %cst_69 = arith.constant dense<0.000000e+00> : vector<2x32xf32>
      %149 = tpu.matmul %147, %148, %cst_69 {dimension_numbers = #tpu.dot_dimension_numbers<[1], [0], [0], [1], [0, 0, 1, 1], [], []>} : vector<2x32xf32>, vector<32x32xf32>, vector<2x32xf32> -> vector<2x32xf32>
      %c0_70 = arith.constant 0 : index
      %c0_71 = arith.constant 0 : index
      %150 = vector.load %arg11[%c0_70, %c0_71] : memref<1x32xf32, #tpu.memory_space<vmem>>, vector<1x32xf32>
      %151 = vector.broadcast %150 : vector<1x32xf32> to vector<2x32xf32>
      %152 = arith.addf %149, %151 : vector<2x32xf32>
      %153 = math.tanh %152 : vector<2x32xf32>
      %c0_72 = arith.constant 0 : index
      %c0_73 = arith.constant 0 : index
      %154 = vector.load %arg12[%c0_72, %c0_73] : memref<32x128xf32, #tpu.memory_space<vmem>>, vector<32x128xf32>
      %cst_74 = arith.constant dense<0.000000e+00> : vector<2x128xf32>
      %155 = tpu.matmul %153, %154, %cst_74 {dimension_numbers = #tpu.dot_dimension_numbers<[1], [0], [0], [1], [0, 0, 1, 1], [], []>} : vector<2x32xf32>, vector<32x128xf32>, vector<2x128xf32> -> vector<2x128xf32>
      %c0_75 = arith.constant 0 : index
      %c0_76 = arith.constant 0 : index
      %156 = vector.load %arg13[%c0_75, %c0_76] : memref<1x128xf32, #tpu.memory_space<vmem>>, vector<1x128xf32>
      %157 = vector.broadcast %156 : vector<1x128xf32> to vector<2x128xf32>
      %158 = arith.addf %155, %157 : vector<2x128xf32>
      %c0_77 = arith.constant 0 : index
      %c0_78 = arith.constant 0 : index
      %159 = vector.load %arg14[%c0_77, %c0_78] : memref<2x128xf32, #tpu.memory_space<vmem>>, vector<2x128xf32>
      tpu.vector_store %arg14[%c0_77, %c0_78], %158 {strides = array<i32>} : memref<2x128xf32, #tpu.memory_space<vmem>>, vector<2x128xf32>,
    } else {
    }
    return
  }
  func.func @transform_0(%arg0: i32) -> (i32, i32) {
    %c0_i32 = arith.constant 0 : i32
    %c0_i32_0 = arith.constant 0 : i32
    %c0_i32_1 = arith.constant 0 : i32
    return %c0_i32, %c0_i32_0 : i32, i32
  }
  func.func @transform_1(%arg0: i32) -> (i32, i32, i32) {
    %c0_i32 = arith.constant 0 : i32
    %c0_i32_0 = arith.constant 0 : i32
    %c0_i32_1 = arith.constant 0 : i32
    %c0_i32_2 = arith.constant 0 : i32
    return %c0_i32, %c0_i32_0, %c0_i32_1 : i32, i32, i32
  }
  func.func @transform_2(%arg0: i32) -> (i32, i32, i32) {
    %c0_i32 = arith.constant 0 : i32
    %c0_i32_0 = arith.constant 0 : i32
    %c0_i32_1 = arith.constant 0 : i32
    return %arg0, %c0_i32, %c0_i32_0 : i32, i32, i32
  }
  func.func @transform_3(%arg0: i32) -> (i32, i32, i32) {
    %c0_i32 = arith.constant 0 : i32
    %c0_i32_0 = arith.constant 0 : i32
    %c0_i32_1 = arith.constant 0 : i32
    return %arg0, %c0_i32, %c0_i32_0 : i32, i32, i32
  }
  func.func @transform_4(%arg0: i32) -> (i32, i32, i32) {
    %c0_i32 = arith.constant 0 : i32
    %c0_i32_0 = arith.constant 0 : i32
    %c0_i32_1 = arith.constant 0 : i32
    return %arg0, %c0_i32, %c0_i32_0 : i32, i32, i32
  }
  func.func @transform_5(%arg0: i32) -> (i32, i32, i32) {
    %c0_i32 = arith.constant 0 : i32
    %c0_i32_0 = arith.constant 0 : i32
    %c0_i32_1 = arith.constant 0 : i32
    return %arg0, %c0_i32, %c0_i32_0 : i32, i32, i32
  }
  func.func @transform_6(%arg0: i32) -> (i32, i32, i32) {
    %c0_i32 = arith.constant 0 : i32
    %c0_i32_0 = arith.constant 0 : i32
    %c0_i32_1 = arith.constant 0 : i32
    return %arg0, %c0_i32, %c0_i32_0 : i32, i32, i32
  }
  func.func @transform_7(%arg0: i32) -> (i32, i32, i32) {
    %c0_i32 = arith.constant 0 : i32
    %c0_i32_0 = arith.constant 0 : i32
    %c0_i32_1 = arith.constant 0 : i32
    return %arg0, %c0_i32, %c0_i32_0 : i32, i32, i32
  }
  func.func @transform_8(%arg0: i32) -> (i32, i32) {
    %c0_i32 = arith.constant 0 : i32
    %c0_i32_0 = arith.constant 0 : i32
    %c0_i32_1 = arith.constant 0 : i32
    return %c0_i32, %c0_i32_0 : i32, i32
  }
  func.func @transform_9(%arg0: i32) -> (i32, i32) {
    %c0_i32 = arith.constant 0 : i32
    %c0_i32_0 = arith.constant 0 : i32
    %c0_i32_1 = arith.constant 0 : i32
    return %c0_i32, %c0_i32_0 : i32, i32
  }
  func.func @transform_10(%arg0: i32) -> (i32, i32) {
    %c0_i32 = arith.constant 0 : i32
    %c0_i32_0 = arith.constant 0 : i32
    %c0_i32_1 = arith.constant 0 : i32
    return %c0_i32, %c0_i32_0 : i32, i32
  }
  func.func @transform_11(%arg0: i32) -> (i32, i32) {
    %c0_i32 = arith.constant 0 : i32
    %c0_i32_0 = arith.constant 0 : i32
    %c0_i32_1 = arith.constant 0 : i32
    return %c0_i32, %c0_i32_0 : i32, i32
  }
  func.func @transform_12(%arg0: i32) -> (i32, i32) {
    %c0_i32 = arith.constant 0 : i32
    %c0_i32_0 = arith.constant 0 : i32
    %c0_i32_1 = arith.constant 0 : i32
    return %c0_i32, %c0_i32_0 : i32, i32
  }
  func.func @transform_13(%arg0: i32) -> (i32, i32) {
    %c0_i32 = arith.constant 0 : i32
    %c0_i32_0 = arith.constant 0 : i32
    %c0_i32_1 = arith.constant 0 : i32
    return %c0_i32, %c0_i32_0 : i32, i32
  }
}

</mosaic_0001>

<bundles_post_ra>
// kernel: tile.9
= control target key start
LH: loop header
LB: loop body
LE: loop exit
PB: predicated region body
PF: predicated region fallthrough
CT: control target
= control target key end

     0   :  { %vm323_vm0 = vcmask 1047556   ;;  %s617_s10 = smov 8   ;;  %vm325_vm1 = vcmask 64512   ;;  %vm398_vm2 = vcmask 130112   ;;  %s908_s0 = inlined_call_operand.vmem [shape: f32[4,2,8,2,8], index: 0, kind: input, shape index: {}]   ;;  %s909_s1 = inlined_call_operand.vmem [shape: f32[4,16,16], index: 1, kind: output, shape index: {}]  }
   0x1   :  { %v595_v0 = vld [vmem:[%s908_s0 + $0xe] sm:$0x3]  ;;  %v596_v1 = vld [vmem:[%s908_s0 + $0xc] sm:$0x3]  ;;  %v597_v2 = vld [vmem:[%s908_s0 + $0xa] sm:$0x3] }
   0x2   :  { %289 = vst [vmem:[#allocation0 + $0x38] sm:$0x3] %v595_v0  ;;  %294 = vst [vmem:[#allocation0 + $0x30] sm:$0x3] %v596_v1  ;;  %v598_v3 = vld [vmem:[%s908_s0 + $0x8] sm:$0x3] }
   0x3   :  { %299 = vst [vmem:[#allocation0 + $0x28] sm:$0x3] %v597_v2  ;;  %v599_v4 = vld [vmem:[%s908_s0 + $0x6] sm:$0x3]  ;;  %v600_v5 = vld [vmem:[%s908_s0 + $0x4] sm:$0x3] }
   0x4   :  { %304 = vst [vmem:[#allocation0 + $0x20] sm:$0x3] %v598_v3  ;;  %309 = vst [vmem:[#allocation0 + $0x18] sm:$0x3] %v599_v4  ;;  %v601_v6 = vld [vmem:[%s908_s0 + $0x2] sm:$0x3] }
   0x5   :  { %314 = vst [vmem:[#allocation0 + $0x10] sm:$0x3] %v600_v5  ;;  %v319_v7 = vld [vmem:[%s908_s0] sm:$0x3]  ;;  %318 = vst [vmem:[#allocation0 + $0x8] sm:$0x3] %v601_v6 }
   0x6   :  { %320 = vst [vmem:[#allocation0] sm:$0x3] %v319_v7  ;;  %v587_v8 = vld [vmem:[%s908_s0 + $0x1e] sm:$0x3]  ;;  %v588_v9 = vld [vmem:[%s908_s0 + $0x1c] sm:$0x3] }
   0x7   :  { %v589_v10 = vld [vmem:[%s908_s0 + $0x1a] sm:$0x3]  ;;  %249 = vst [vmem:[#allocation0 + $0x78] sm:$0x3] %v587_v8  ;;  %254 = vst [vmem:[#allocation0 + $0x70] sm:$0x3] %v588_v9 }
   0x8   :  { %259 = vst [vmem:[#allocation0 + $0x68] sm:$0x3] %v589_v10  ;;  %v590_v11 = vld [vmem:[%s908_s0 + $0x18] sm:$0x3]  ;;  %v591_v12 = vld [vmem:[%s908_s0 + $0x16] sm:$0x3] }
   0x9   :  { %v592_v13 = vld [vmem:[%s908_s0 + $0x14] sm:$0x3]  ;;  %264 = vst [vmem:[#allocation0 + $0x60] sm:$0x3] %v590_v11  ;;  %269 = vst [vmem:[#allocation0 + $0x58] sm:$0x3] %v591_v12 }
   0xa   :  { %274 = vst [vmem:[#allocation0 + $0x50] sm:$0x3] %v592_v13  ;;  %v593_v14 = vld [vmem:[%s908_s0 + $0x12] sm:$0x3]  ;;  %v594_v15 = vld [vmem:[%s908_s0 + $0x10] sm:$0x3] }
   0xb   :  { %v563_v16 = vld [vmem:[%s908_s0 + $0x4e] sm:$0x3]  ;;  %279 = vst [vmem:[#allocation0 + $0x48] sm:$0x3] %v593_v14  ;;  %284 = vst [vmem:[#allocation0 + $0x40] sm:$0x3] %v594_v15 }
   0xc   :  { %129 = vst [vmem:[#allocation0 + $0x138] sm:$0x3] %v563_v16  ;;  %v564_v17 = vld [vmem:[%s908_s0 + $0x4c] sm:$0x3]  ;;  %v565_v18 = vld [vmem:[%s908_s0 + $0x4a] sm:$0x3] }
   0xd   :  { %v566_v19 = vld [vmem:[%s908_s0 + $0x48] sm:$0x3]  ;;  %134 = vst [vmem:[#allocation0 + $0x130] sm:$0x3] %v564_v17  ;;  %139 = vst [vmem:[#allocation0 + $0x128] sm:$0x3] %v565_v18 }
   0xe   :  { %144 = vst [vmem:[#allocation0 + $0x120] sm:$0x3] %v566_v19  ;;  %v567_v20 = vld [vmem:[%s908_s0 + $0x46] sm:$0x3]  ;;  %v568_v21 = vld [vmem:[%s908_s0 + $0x44] sm:$0x3] }
   0xf   :  { %v569_v22 = vld [vmem:[%s908_s0 + $0x42] sm:$0x3]  ;;  %149 = vst [vmem:[#allocation0 + $0x118] sm:$0x3] %v567_v20  ;;  %154 = vst [vmem:[#allocation0 + $0x110] sm:$0x3] %v568_v21 }
  0x10   :  { %159 = vst [vmem:[#allocation0 + $0x108] sm:$0x3] %v569_v22  ;;  %v570_v23 = vld [vmem:[%s908_s0 + $0x40] sm:$0x3]  ;;  %v555_v24 = vld [vmem:[%s908_s0 + $0x5e] sm:$0x3] }
  0x11   :  { %v556_v25 = vld [vmem:[%s908_s0 + $0x5c] sm:$0x3]  ;;  %v393_v26 = vld [vmem:[#allocation0 + $0x1] ss:$8 sm:$0xf0]  }
  0x12   :  { %164 = vst [vmem:[#allocation0 + $0x100] sm:$0x3] %v570_v23  ;;  %89 = vst [vmem:[#allocation0 + $0x178] sm:$0x3] %v555_v24  ;;  %v557_v27 = vld [vmem:[%s908_s0 + $0x5a] sm:$0x3] }
  0x13   :  { %94 = vst [vmem:[#allocation0 + $0x170] sm:$0x3] %v556_v25  ;;  %v391_v28 = vld [vmem:[#allocation0 + $0x1] ss:$8 sm:$0xf]  }
  0x14   :  { %99 = vst [vmem:[#allocation0 + $0x168] sm:$0x3] %v557_v27  ;;  %v558_v29 = vld [vmem:[%s908_s0 + $0x58] sm:$0x3]  ;;  %v395_v30 = vsel %vm323_vm0, %v393_v26, %v391_v28  ;;  %v559_v31 = vld [vmem:[%s908_s0 + $0x56] sm:$0x3] }
  0x15   :  { %104 = vst [vmem:[#allocation0 + $0x160] sm:$0x3] %v558_v29  ;;  %v560_v32 = vld [vmem:[%s908_s0 + $0x54] sm:$0x3]  ;;  %v561_v33 = vld [vmem:[%s908_s0 + $0x52] sm:$0x3]  ;;  %396 = vrot.lane.b32.xlu0 %v395_v30, %s617_s10 }
  0x16   :  { %v414_v34 = vld [vmem:[#allocation0 + $0x41] ss:$8 sm:$0xf0]   ;;  %109 = vst [vmem:[#allocation0 + $0x158] sm:$0x3] %v559_v31 }
  0x17   :  { %114 = vst [vmem:[#allocation0 + $0x150] sm:$0x3] %v560_v32  ;;  %119 = vst [vmem:[#allocation0 + $0x148] sm:$0x3] %v561_v33  ;;  %v562_v35 = vld [vmem:[%s908_s0 + $0x50] sm:$0x3] }
  0x18   :  { %v412_v36 = vld [vmem:[#allocation0 + $0x41] ss:$8 sm:$0xf]   ;;  %124 = vst [vmem:[#allocation0 + $0x140] sm:$0x3] %v562_v35 }
  0x19   :  { %v579_v37 = vld [vmem:[%s908_s0 + $0x2e] sm:$0x3]  ;;  %v416_v38 = vsel %vm323_vm0, %v414_v34, %v412_v36  ;;  %v403_v39 = vld [vmem:[#allocation0 + $0x101] ss:$8 sm:$0xf0]  }
  0x1a   :  { %209 = vst [vmem:[#allocation0 + $0xb8] sm:$0x3] %v579_v37  ;;  %v580_v40 = vld [vmem:[%s908_s0 + $0x2c] sm:$0x3]  ;;  %417 = vrot.lane.b32.xlu1 %v416_v38, %s617_s10  ;;  %v581_v41 = vld [vmem:[%s908_s0 + $0x2a] sm:$0x3] }
  0x1b   :  { %214 = vst [vmem:[#allocation0 + $0xb0] sm:$0x3] %v580_v40  ;;  %v582_v42 = vld [vmem:[%s908_s0 + $0x28] sm:$0x3]  ;;  %v583_v43 = vld [vmem:[%s908_s0 + $0x26] sm:$0x3] }
  0x1c   :  { %v401_v44 = vld [vmem:[#allocation0 + $0x101] ss:$8 sm:$0xf]   ;;  %219 = vst [vmem:[#allocation0 + $0xa8] sm:$0x3] %v581_v41 }
  0x1d   :  { %224 = vst [vmem:[#allocation0 + $0xa0] sm:$0x3] %v582_v42  ;;  %229 = vst [vmem:[#allocation0 + $0x98] sm:$0x3] %v583_v43  ;;  %v584_v45 = vld [vmem:[%s908_s0 + $0x24] sm:$0x3]  ;;  %v405_v46 = vsel %vm323_vm0, %v403_v39, %v401_v44 }
  0x1e   :  { %234 = vst [vmem:[#allocation0 + $0x90] sm:$0x3] %v584_v45  ;;  %v585_v47 = vld [vmem:[%s908_s0 + $0x22] sm:$0x3]  ;;  %v586_v48 = vld [vmem:[%s908_s0 + $0x20] sm:$0x3]  ;;  %406 = vrot.lane.b32.xlu0 %v405_v46, %s617_s10 }
  0x1f   :  { %v547_v49 = vld [vmem:[%s908_s0 + $0x6e] sm:$0x3]  ;;  %v425_v50 = vld [vmem:[#allocation0 + $0x141] ss:$8 sm:$0xf0]  }
  0x20   :  { %239 = vst [vmem:[#allocation0 + $0x88] sm:$0x3] %v585_v47  ;;  %244 = vst [vmem:[#allocation0 + $0x80] sm:$0x3] %v586_v48  ;;  %v548_v51 = vld [vmem:[%s908_s0 + $0x6c] sm:$0x3] }
  0x21   :  { %49 = vst [vmem:[#allocation0 + $0x1b8] sm:$0x3] %v547_v49  ;;  %54 = vst [vmem:[#allocation0 + $0x1b0] sm:$0x3] %v548_v51  ;;  %v549_v52 = vld [vmem:[%s908_s0 + $0x6a] sm:$0x3] }
  0x22   :  { %v550_v53 = vld [vmem:[%s908_s0 + $0x68] sm:$0x3]  ;;  %v551_v54 = vld [vmem:[%s908_s0 + $0x66] sm:$0x3]  ;;  %59 = vst [vmem:[#allocation0 + $0x1a8] sm:$0x3] %v549_v52 }
  0x23   :  { %v423_v55 = vld [vmem:[#allocation0 + $0x141] ss:$8 sm:$0xf]   ;;  %64 = vst [vmem:[#allocation0 + $0x1a0] sm:$0x3] %v550_v53 }
  0x24   :  { %69 = vst [vmem:[#allocation0 + $0x198] sm:$0x3] %v551_v54  ;;  %v552_v56 = vld [vmem:[%s908_s0 + $0x64] sm:$0x3]  ;;  %v427_v57 = vsel %vm323_vm0, %v425_v50, %v423_v55  ;;  %v553_v58 = vld [vmem:[%s908_s0 + $0x62] sm:$0x3] }
  0x25   :  { %74 = vst [vmem:[#allocation0 + $0x190] sm:$0x3] %v552_v56  ;;  %v554_v59 = vld [vmem:[%s908_s0 + $0x60] sm:$0x3]  ;;  %v571_v60 = vld [vmem:[%s908_s0 + $0x3e] sm:$0x3]  ;;  %428 = vrot.lane.b32.xlu1 %v427_v57, %s617_s10 }
  0x26   :  { %79 = vst [vmem:[#allocation0 + $0x188] sm:$0x3] %v553_v58  ;;  %84 = vst [vmem:[#allocation0 + $0x180] sm:$0x3] %v554_v59  ;;  %v572_v61 = vld [vmem:[%s908_s0 + $0x3c] sm:$0x3] }
  0x27   :  { %169 = vst [vmem:[#allocation0 + $0xf8] sm:$0x3] %v571_v60  ;;  %v573_v62 = vld [vmem:[%s908_s0 + $0x3a] sm:$0x3]  ;;  %v574_v63 = vld [vmem:[%s908_s0 + $0x38] sm:$0x3] }
  0x28   :  { %v436_v0 = vld [vmem:[#allocation0 + $0x81] ss:$8 sm:$0xf0]   ;;  %174 = vst [vmem:[#allocation0 + $0xf0] sm:$0x3] %v572_v61 }
  0x29   :  { %179 = vst [vmem:[#allocation0 + $0xe8] sm:$0x3] %v573_v62  ;;  %184 = vst [vmem:[#allocation0 + $0xe0] sm:$0x3] %v574_v63  ;;  %v575_v1 = vld [vmem:[%s908_s0 + $0x36] sm:$0x3] }
  0x2a   :  { %189 = vst [vmem:[#allocation0 + $0xd8] sm:$0x3] %v575_v1  ;;  %v576_v2 = vld [vmem:[%s908_s0 + $0x34] sm:$0x3]  ;;  %v577_v3 = vld [vmem:[%s908_s0 + $0x32] sm:$0x3] }
  0x2b   :  { %v578_v4 = vld [vmem:[%s908_s0 + $0x30] sm:$0x3]  ;;  %194 = vst [vmem:[#allocation0 + $0xd0] sm:$0x3] %v576_v2  ;;  %199 = vst [vmem:[#allocation0 + $0xc8] sm:$0x3] %v577_v3 }
  0x2c   :  { %v434_v5 = vld [vmem:[#allocation0 + $0x81] ss:$8 sm:$0xf]   ;;  %204 = vst [vmem:[#allocation0 + $0xc0] sm:$0x3] %v578_v4 }
  0x2d   :  { %v539_v6 = vld [vmem:[%s908_s0 + $0x7e] sm:$0x3]  ;;  %v438_v7 = vsel %vm323_vm0, %v436_v0, %v434_v5  ;;  %v540_v8 = vld [vmem:[%s908_s0 + $0x7c] sm:$0x3]  ;;  %v541_v9 = vld [vmem:[%s908_s0 + $0x7a] sm:$0x3] }
  0x2e   :  { %9 = vst [vmem:[#allocation0 + $0x1f8] sm:$0x3] %v539_v6  ;;  %v542_v10 = vld [vmem:[%s908_s0 + $0x78] sm:$0x3]  ;;  %439 = vrot.lane.b32.xlu0 %v438_v7, %s617_s10  ;;  %14 = vst [vmem:[#allocation0 + $0x1f0] sm:$0x3] %v540_v8 }
  0x2f   :  { %v447_v11 = vld [vmem:[#allocation0 + $0x181] ss:$8 sm:$0xf0]   ;;  %19 = vst [vmem:[#allocation0 + $0x1e8] sm:$0x3] %v541_v9 }
  0x30   :  { %24 = vst [vmem:[#allocation0 + $0x1e0] sm:$0x3] %v542_v10  ;;  %v543_v12 = vld [vmem:[%s908_s0 + $0x76] sm:$0x3]  ;;  %v544_v13 = vld [vmem:[%s908_s0 + $0x74] sm:$0x3] }
  0x31   :  { %29 = vst [vmem:[#allocation0 + $0x1d8] sm:$0x3] %v543_v12  ;;  %v545_v14 = vld [vmem:[%s908_s0 + $0x72] sm:$0x3]  ;;  %v546_v15 = vld [vmem:[%s908_s0 + $0x70] sm:$0x3] }
  0x32   :  { %v445_v16 = vld [vmem:[#allocation0 + $0x181] ss:$8 sm:$0xf]   ;;  %34 = vst [vmem:[#allocation0 + $0x1d0] sm:$0x3] %v544_v13 }
  0x33   :  { %39 = vst [vmem:[#allocation0 + $0x1c8] sm:$0x3] %v545_v14  ;;  %44 = vst [vmem:[#allocation0 + $0x1c0] sm:$0x3] %v546_v15  ;;  %v449_v18 = vsel %vm323_vm0, %v447_v11, %v445_v16 }
  0x34   :  { %v321_v17 = vld [vmem:[#allocation0] ss:$8 sm:$0xf]   ;;  %v458_v19 = vld [vmem:[#allocation0 + $0xc1] ss:$8 sm:$0xf0]   ;;  %450 = vrot.lane.b32.xlu1 %v449_v18, %s617_s10 }
  0x35   :  { %v322_v20 = vld [vmem:[#allocation0] ss:$8 sm:$0xf0]   ;;  %v456_v24 = vld [vmem:[#allocation0 + $0xc1] ss:$8 sm:$0xf]  }
  0x36   :  { %v324_v21 = vsel %vm323_vm0, %v322_v20, %v321_v17  ;;  %v328_v22 = vld [vmem:[#allocation0 + $0x40] ss:$8 sm:$0xf]   ;;  %v460_v27 = vsel %vm323_vm0, %v458_v19, %v456_v24 }
  0x37   :  { %v330_v23 = vld [vmem:[#allocation0 + $0x40] ss:$8 sm:$0xf0]   ;;  %326 = vst.msk [vmem:[%s909_s1] sm:$0xff] %vm325_vm1, %v324_v21   ;;  %461 = vrot.lane.b32.xlu0 %v460_v27, %s617_s10 }
  0x38   :  { %v332_v25 = vsel %vm323_vm0, %v330_v23, %v328_v22  ;;  %v355_v26 = vld [vmem:[#allocation0 + $0x100] ss:$8 sm:$0xf]   ;;  %v469_v30 = vld [vmem:[#allocation0 + $0x1c1] ss:$8 sm:$0xf0]  }
  0x39   :  { %602 = vst.msk [vmem:[%s909_s1 + $0x8] sm:$0xff] %vm325_vm1, %v332_v25   ;;  %v357_v28 = vld [vmem:[#allocation0 + $0x100] ss:$8 sm:$0xf0]  }
  0x3a   :  { %v364_v29 = vld [vmem:[#allocation0 + $0x140] ss:$8 sm:$0xf]   ;;  %v359_v31 = vsel %vm323_vm0, %v357_v28, %v355_v26  ;;  %v467_v36 = vld [vmem:[#allocation0 + $0x1c1] ss:$8 sm:$0xf]  }
  0x3b   :  { %v366_v32 = vld [vmem:[#allocation0 + $0x140] ss:$8 sm:$0xf0]   ;;  %605 = vst.msk [vmem:[%s909_s1 + $0x20] sm:$0xff] %vm325_vm1, %v359_v31   ;;  %v471_v39 = vsel %vm323_vm0, %v469_v30, %v467_v36 }
  0x3c   :  { %v368_v33 = vsel %vm323_vm0, %v366_v32, %v364_v29  ;;  %v337_v34 = vld [vmem:[#allocation0 + $0x80] ss:$8 sm:$0xf]   ;;  %472 = vrot.lane.b32.xlu1 %v471_v39, %s617_s10 }
  0x3d   :  { %v339_v35 = vld [vmem:[#allocation0 + $0x80] ss:$8 sm:$0xf0]   ;;  %606 = vst.msk [vmem:[%s909_s1 + $0x28] sm:$0xff] %vm325_vm1, %v368_v33  }
  0x3e   :  { %v341_v37 = vsel %vm323_vm0, %v339_v35, %v337_v34  ;;  %v373_v38 = vld [vmem:[#allocation0 + $0x180] ss:$8 sm:$0xf]  }
  0x3f   :  { %603 = vst.msk [vmem:[%s909_s1 + $0x10] sm:$0xff] %vm325_vm1, %v341_v37   ;;  %v375_v40 = vld [vmem:[#allocation0 + $0x180] ss:$8 sm:$0xf0]  }
  0x40   :  { %v346_v41 = vld [vmem:[#allocation0 + $0xc0] ss:$8 sm:$0xf]   ;;  %v377_v42 = vsel %vm323_vm0, %v375_v40, %v373_v38 }
  0x41   :  { %v348_v43 = vld [vmem:[#allocation0 + $0xc0] ss:$8 sm:$0xf0]   ;;  %607 = vst.msk [vmem:[%s909_s1 + $0x30] sm:$0xff] %vm325_vm1, %v377_v42  }
  0x42   :  { %v382_v44 = vld [vmem:[#allocation0 + $0x1c0] ss:$8 sm:$0xf]   ;;  %v350_v45 = vsel %vm323_vm0, %v348_v43, %v346_v41 }
  0x43   :  { %v384_v46 = vld [vmem:[#allocation0 + $0x1c0] ss:$8 sm:$0xf0]   ;;  %604 = vst.msk [vmem:[%s909_s1 + $0x18] sm:$0xff] %vm325_vm1, %v350_v45  }
  0x44   :  { %v386_v47 = vsel %vm323_vm0, %v384_v46, %v382_v44 }
  0x45   :  { %608 = vst.msk [vmem:[%s909_s1 + $0x38] sm:$0xff] %vm325_vm1, %v386_v47  }
  0x87   :  { %v397_v48 = vpop.permute.xlu0 %396  }
  0x88   :  { %399 = vst.msk [vmem:[%s909_s1] sm:$0xff] %vm398_vm2, %v397_v48  }
  0x8c   :  { %v418_v49 = vpop.permute.xlu1 %417  }
  0x8d   :  { %610 = vst.msk [vmem:[%s909_s1 + $0x8] sm:$0xff] %vm398_vm2, %v418_v49  }
  0x90   :  { %v407_v50 = vpop.permute.xlu0 %406  }
  0x91   :  { %609 = vst.msk [vmem:[%s909_s1 + $0x20] sm:$0xff] %vm398_vm2, %v407_v50  }
  0x97   :  { %v429_v51 = vpop.permute.xlu1 %428  }
  0x98   :  { %611 = vst.msk [vmem:[%s909_s1 + $0x28] sm:$0xff] %vm398_vm2, %v429_v51  }
  0xa0   :  { %v440_v52 = vpop.permute.xlu0 %439  }
  0xa1   :  { %612 = vst.msk [vmem:[%s909_s1 + $0x10] sm:$0xff] %vm398_vm2, %v440_v52  }
  0xa6   :  { %v451_v53 = vpop.permute.xlu1 %450  }
  0xa7   :  { %613 = vst.msk [vmem:[%s909_s1 + $0x30] sm:$0xff] %vm398_vm2, %v451_v53  }
  0xa9   :  { %v462_v54 = vpop.permute.xlu0 %461  }
  0xaa   :  { %614 = vst.msk [vmem:[%s909_s1 + $0x18] sm:$0xff] %vm398_vm2, %v462_v54  }
  0xae   :  { %v473_v55 = vpop.permute.xlu1 %472  }
  0xaf   :  { %615 = vst.msk [vmem:[%s909_s1 + $0x38] sm:$0xff] %vm398_vm2, %v473_v55  }

// kernel: custom_model_forward.1
= control target key start
LH: loop header
LB: loop body
LE: loop exit
PB: predicated region body
PF: predicated region fallthrough
CT: control target
= control target key end

     0   :  { %s3045_s0 = inlined_call_operand.vmem [shape: f32[16,32], index: 0, kind: input, shape index: {}]   ;;  %s3046_s1 = inlined_call_operand.vmem [shape: f32[4,16,16], index: 1, kind: input, shape index: {}]   ;;  %s3047_s2 = inlined_call_operand.vmem [shape: f32[2,1,32], index: 2, kind: input, shape index: {}]   ;;  %s3048_s3 = inlined_call_operand.vmem [shape: f32[2,32,96], index: 3, kind: input, shape index: {}]   ;;  %s3049_s4 = inlined_call_operand.vmem [shape: f32[2,32,32], index: 4, kind: input, shape index: {}]   ;;  %s3050_s5 = inlined_call_operand.vmem [shape: f32[2,1,32], index: 5, kind: input, shape index: {}]   ;;  %s3051_s6 = inlined_call_operand.vmem [shape: f32[2,32,64], index: 6, kind: input, shape index: {}]   ;;  %s3052_s7 = inlined_call_operand.vmem [shape: f32[2,64,32], index: 7, kind: input, shape index: {}]   ;;  %s3053_s8 = inlined_call_operand.vmem [shape: f32[1,32], index: 8, kind: input, shape index: {}]   ;;  %s3054_s9 = inlined_call_operand.vmem [shape: f32[32,32], index: 9, kind: input, shape index: {}]   ;;  %s3055_s10 = inlined_call_operand.vmem [shape: f32[1,32], index: 10, kind: input, shape index: {}]   ;;  %s3056_s11 = inlined_call_operand.vmem [shape: f32[32,128], index: 11, kind: input, shape index: {}]   ;;  %s3057_s12 = inlined_call_operand.vmem [shape: f32[1,128], index: 12, kind: input, shape index: {}]   ;;  %s3058_s13 = inlined_call_operand.hbm [shape: f32[2,128], index: 13, kind: output, shape index: {}]  }
   0x1   :  { %3060 = sst [smem:[#allocation7_spill]] %s3058_s13 }
   0x2   :  { %18 = vsyncpa [#allocation4], 0  ;;  %s2765_s25 = smov 0  }
   0x3 LB: > { %3061 = sst [smem:[#allocation6_spill]] %s2679_s25  ;;  %s2771_s26 = sadd.s32 4294967295, %s2679_s25   ;;  %s2679_s25 = sphi %s2765_s25, %s24_s25  }
   0x4   : > { %p2288_p0 = scmp.ge.s32.totalorder %s2679_s25, 1  ;;  %p429_p1 = scmp.lt.s32.totalorder %s2679_s25, 3 }
   0x6   : > { %p430_p2 = pnand %p2288_p0, %p429_p1 }
   0x7   : > { %p489_p3 = scmp.lt.s32.totalorder (!%p430_p2), %s2771_s26, 1  ;;  %p2297_p4 = scmp.ne.s32.totalorder (!%p430_p2), %s2771_s26, 0 }
   0x8   : > { %433 = sbr.rel (%p430_p2) target bundleno = 3506 (0xdb2), region = 72 }
   0xd   : > { %s2777_s27 = scalar_select %p489_p3, %s2771_s26, 1 }
   0xe   : > { %518 = sbr.rel (%p2297_p4) target bundleno = 21 (0x15), region = 76 }
   0xf   : > { %s2354_s14 = sshll.u32 %s2777_s27, 5  ;;  %s504_s23 = scalar_lea.vmem %s3050_s5, %s2777_s27 }
  0x10   : > { %s2787_s17 = scalar_lea.vmem %s3048_s3, %s2354_s14  ;;  %s2792_s20 = scalar_lea.vmem %s3049_s4, %s2354_s14 }
  0x11   : > { %s2801_s29 = scalar_lea.vmem %s3051_s6, %s2354_s14  ;;  %s2357_s30 = sshll.u32 %s2777_s27, 6 }
  0x12   : > { %s2807_s15 = scalar_lea.vmem %s3052_s7, %s2357_s30 }
  0x13   : > { %v519_v0 = vld [vmem:[%s3045_s0] sm:$0xff]  ;;  %vm521_vm0 = vcmask 261120   ;;  %v520_v1 = vld [vmem:[%s3045_s0 + $0x8] sm:$0xff] }
  0x14   : > { %522 = vst.msk [vmem:[#allocation2] sm:$0xff] %vm521_vm0, %v519_v0  ;;  %523 = vst.msk [vmem:[#allocation2 + $0x8] sm:$0xff] %vm521_vm0, %v520_v1 }
  0x15 PF: > { %vm529_vm1 = vcmask 261120   ;;  %v556_v8 = vld [vmem:[%s2787_s17 + $0x18] sm:$0xff]  ;;  %v555_v9 = vld [vmem:[%s2787_s17 + $0x10] sm:$0xff]  ;;  %v554_v10 = vld [vmem:[%s2787_s17 + $0x8] sm:$0xff]  ;;  %s3062_s30 = scalar_lea.vmem %s3047_s2, %s2777_s27  ;;  %vm650_vm2 = vcmask 64512   ;;  %s2681_s14 = smov 88  }
  0x16   : > { %2434 = vmatprep.subr.mxu0 %v556_v8  ;;  %v553_v11 = vld [vmem:[%s2787_s17] sm:$0xff]  ;;  %s2682_s17 = smov 96   ;;  %s2683_s22 = smov 120   ;;  %v643_v33 = vld [vmem:[%s3046_s1 + $0x8] sm:$0xff]  ;;  %vm734_vm3 = vcmask 130048   ;;  %v2307_v42 = vld [vmem:[%s3046_s1 + $0x10] sm:$0xff] }
  0x17   : > { %2435 = vmatpush3.msra.mxu0 %v556_v8  ;;  %v2298_v19 = vld [vmem:[%s3062_s30] ss:$0 sm:$0xff]  ;;  %v2308_v43 = vld [vmem:[%s3046_s1 + $0x18] sm:$0xff]  ;;  %s2684_s30 = smov 64   ;;  %s2688_s24 = smov 72   ;;  %vm1903_vm4 = vcmask 523264  }
  0x18   : > { %2436 = vmatprep.subr.mxu0 %v555_v9  ;;  %v642_v35 = vld [vmem:[%s3046_s1] sm:$0xff]  ;;  %s2689_s28 = smov 104   ;;  %s2690_s13 = smov 48  }
  0x19   : > { %2437 = vmatpush3.msra.mxu0 %v555_v9  ;;  %p2344_p5 = scmp.ne.s32.totalorder %s2771_s26, 1 }
  0x1a   : > { %2438 = vmatprep.subr.mxu0 %v554_v10 }
  0x1b   : > { %v2816_v2 = vld [vmem:[#allocation2] sm:$0xff]  ;;  %v2818_v3 = vld [vmem:[#allocation2 + $0x8] sm:$0xff]  ;;  %2439 = vmatpush3.msra.mxu0 %v554_v10 }
  0x1c   : > { %v527_v4 = vmul.f32 %v2816_v2, %v2816_v2  ;;  %v528_v5 = vmul.f32 %v2818_v3, %v2818_v3  ;;  %2440 = vmatprep.subr.mxu0 %v553_v11 }
  0x1d   : > { %2441 = vmatpush3.msra.mxu0 %v553_v11 }
  0x1e   : > { %v530_v6 = vsel %vm529_vm1, %v527_v4, 0.0  ;;  %v533_v7 = vsel %vm529_vm1, %v528_v5, 0.0 }
  0x1f   : > { %531 = vadd.xlane.f32.xlu0 %v530_v6 }
  0x23   : > { %534 = vadd.xlane.f32.xlu0 %v533_v7 }
  0xa8   : > { %v532_v12 = vpop.xlane.xlu0 %531 }
  0xa9   : > { %v537_v13 = vmul.f32 0.03125, %v532_v12 }
  0xab   : > { %v539_v14 = vadd.f32 1e-06, %v537_v13 }
  0xac   : > { %v535_v15 = vpop.xlane.xlu0 %534 }
  0xad   : > { %2601 = vrsqrt.f32 %v539_v14  ;;  %v538_v16 = vmul.f32 0.03125, %v535_v15 }
  0xaf   : > { %v540_v17 = vadd.f32 1e-06, %v538_v16 }
  0xb1   : > { %2603 = vrsqrt.f32 %v540_v17 }
  0xba   : > { %v2602_v18 = vpop.eup %2601 }
  0xbb   : > { %v543_v20 = vmul.f32 %v2602_v18, %v2816_v2 }
  0xbd   : > { %v551_v21 = vmul.f32 %v2298_v19, %v543_v20 }
  0xbe   : > { %v2604_v22 = vpop.eup %2603 }
  0xbf   : > { %v544_v23 = vmul.f32 %v2604_v22, %v2818_v3  ;;  %2442 = vmatprep.mubr.msk.f32.mxu0 %vm529_vm1, %v551_v21 }
  0xc1   : > { %v552_v24 = vmul.f32 %v2298_v19, %v544_v23  ;;  %v639_v23 = vld [vmem:[%s2792_s20 + $0x8] sm:$0xff] }
  0xc3   : > { %2443 = vmatmul.mubr.msk.f32.vlgmr.msra.gmra.mxu0 %vm529_vm1, %v552_v24  ;;  %v638_v24 = vld [vmem:[%s2792_s20] sm:$0xff] }
 0x183   : > { %v2839_v25 = vpop.f32.mrf.mxu0 }
 0x184   : > { %853 = vrot.lane.b32.xlu0 %v2839_v25, %s2681_s14  ;;  %648 = vrot.lane.b32.xlu1 %v2839_v25, %s2682_s17 }
 0x185   : > { %v2843_v26 = vpop.f32.mrf.mxu0 }
 0x186   : > { %2449 = vmatprep.mubr.msk.f32.mxu1 %vm650_vm2, %v2843_v26 }
 0x188   : > { %646 = vrot.lane.b32.xlu1 %v2843_v26, %s2682_s17  ;;  %s2686_s17 = smov 80  }
 0x18c   : > { %851 = vrot.lane.b32.xlu1 %v2843_v26, %s2681_s14  ;;  %s2685_s14 = smov 56  }
 0x190   : > { %847 = vrot.lane.b32.xlu1 %v2843_v26, %s2683_s22 }
 0x194   : > { %849 = vrot.lane.b32.xlu1 %v2839_v25, %s2683_s22  ;;  %s2687_s22 = smov 112  }
 0x1f6   : > { %v649_v27 = vpop.permute.xlu1 %648  ;;  %v854_v29 = vpop.permute.xlu0 %853 }
 0x1f7   : > { %2445 = vmatprep.subr.msk.mxu1 %vm650_vm2, %v649_v27 }
 0x1f8   : > { %2446 = vmatpush3.xpose.msk.msra.mxu1 %vm650_vm2, %v649_v27 }
 0x1fa   : > { %v647_v28 = vpop.permute.xlu1 %646 }
 0x1fb   : > { %2447 = vmatprep.subr.msk.mxu1 %vm650_vm2, %v647_v28 }
 0x1fc   : > { %2448 = vmatpush3.xpose.msk.msra.mxu1 %vm650_vm2, %v647_v28 }
 0x1fd   : > { %2459 = vmatprep.subr.msk.mxu1 %vm650_vm2, %v854_v29 }
 0x1fe   : > { %v852_v30 = vpop.permute.xlu1 %851 }
 0x1ff   : > { %2450 = vmatmul.mubr.msk.f32.vlgmr.msra.gmra.mxu1 %vm650_vm2, %v2839_v25 }
 0x200   : > { %2460 = vmatpush3.xpose.msk.msra.mxu1 %vm650_vm2, %v854_v29 }
 0x201   : > { %2461 = vmatprep.subr.msk.mxu1 %vm650_vm2, %v852_v30 }
 0x202   : > { %v848_v31 = vpop.permute.xlu1 %847 }
 0x203   : > { %2463 = vmatprep.mubr.msk.f32.mxu1 %vm650_vm2, %v848_v31 }
 0x204   : > { %2462 = vmatpush3.xpose.msk.msra.mxu1 %vm650_vm2, %v852_v30 }
 0x206   : > { %v850_v32 = vpop.permute.xlu1 %849 }
 0x207   : > { %2464 = vmatmul.mubr.msk.f32.vlgmr.msra.gmra.mxu1 %vm650_vm2, %v850_v32 }
 0x2bf   : > { %v2451_v34 = vpop.f32.mrf.mxu1 }
 0x2c0   : > { %v731_v36 = vadd.f32 %v2451_v34, %v643_v33 }
 0x2c1   : > { %v725_v37 = vpop.f32.mrf.mxu1 }
 0x2c2   : > { %v726_v38 = vadd.f32 %v725_v37, %v642_v35  ;;  %v738_v39 = vsel %vm734_vm3, %v731_v36, -inf }
 0x2c3   : > { %739 = vmax.xlane.f32.xlu0 %v738_v39 }
 0x2c4   : > { %v735_v40 = vsel %vm734_vm3, %v726_v38, -inf }
 0x2c5   : > { %736 = vmax.xlane.f32.xlu1 %v735_v40 }
 0x2c7   : > { %v2465_v41 = vpop.f32.mrf.mxu1 }
 0x2c8   : > { %v935_v46 = vadd.f32 %v2465_v41, %v2308_v43 }
 0x2c9   : > { %v929_v44 = vpop.f32.mrf.mxu1 }
 0x2ca   : > { %v930_v45 = vadd.f32 %v2307_v42, %v929_v44  ;;  %v941_v48 = vsel %vm734_vm3, %v935_v46, -inf }
 0x2cc   : > { %v938_v47 = vsel %vm734_vm3, %v930_v45, -inf }
 0x2cd   : > { %939 = vmax.xlane.f32.xlu1 %v938_v47  ;;  %v2319_v47 = vld [vmem:[%s3046_s1 + $0x20] sm:$0xff] }
 0x2d1   : > { %942 = vmax.xlane.f32.xlu1 %v941_v48 }
 0x2d9   : > { %759 = vrot.lane.b32.xlu0 %v2839_v25, %s2684_s30 }
 0x2e2   : > { %757 = vrot.lane.b32.xlu1 %v2843_v26, %s2684_s30 }
 0x34c   : > { %v740_v49 = vpop.xlane.xlu0 %739 }
 0x34d   : > { %v742_v50 = vsub.f32 %v731_v36, %v740_v49 }
 0x34e   : > { %v737_v51 = vpop.xlane.xlu1 %736 }
 0x34f   : > { %v745_v52 = vmul.f32 1.442695, %v742_v50  ;;  %v741_v53 = vsub.f32 %v726_v38, %v737_v51 }
 0x350   : > { %v760_v54 = vpop.permute.xlu0 %759 }
 0x351   : > { %2605 = vpow2.f32 %v745_v52  ;;  %v743_v55 = vmul.f32 1.442695, %v741_v53  ;;  %2452 = vmatprep.subr.mxu0 %v760_v54 }
 0x352   : > { %2453 = vmatpush3.msra.mxu0 %v760_v54 }
 0x353   : > { %2607 = vpow2.f32 %v743_v55 }
 0x356   : > { %v940_v56 = vpop.xlane.xlu1 %939 }
 0x357   : > { %v944_v57 = vsub.f32 %v930_v45, %v940_v56  ;;  %v2320_v45 = vld [vmem:[%s3046_s1 + $0x28] sm:$0xff] }
 0x359   : > { %v946_v58 = vmul.f32 1.442695, %v944_v57 }
 0x35a   : > { %v943_v59 = vpop.xlane.xlu1 %942 }
 0x35b   : > { %2609 = vpow2.f32 %v946_v58  ;;  %v945_v60 = vsub.f32 %v935_v46, %v943_v59 }
 0x35d   : > { %v948_v61 = vmul.f32 1.442695, %v945_v60 }
 0x35e   : > { %v2606_v62 = vpop.eup %2605  ;;  %v758_v63 = vpop.permute.xlu1 %757 }
 0x35f   : > { %2611 = vpow2.f32 %v948_v61  ;;  %2454 = vmatprep.subr.mxu0 %v758_v63  ;;  %v750_v0 = vsel %vm734_vm3, %v2606_v62, 0.0 }
 0x360   : > { %v2608_v1 = vpop.eup %2607  ;;  %751 = vadd.xlane.f32.xlu1 %v750_v0  ;;  %2455 = vmatpush3.msra.mxu0 %v758_v63 }
 0x361   : > { %v747_v4 = vsel %vm734_vm3, %v2608_v1, 0.0 }
 0x362   : > { %748 = vadd.xlane.f32.xlu0 %v747_v4  ;;  %v2330_v4 = vld [vmem:[%s3046_s1 + $0x38] sm:$0xff] }
 0x368   : > { %v2610_v5 = vpop.eup %2609 }
 0x369   : > { %v950_v6 = vsel %vm734_vm3, %v2610_v5, 0.0 }
 0x36a   : > { %951 = vadd.xlane.f32.xlu0 %v950_v6 }
 0x36c   : > { %v2612_v7 = vpop.eup %2611 }
 0x36d   : > { %v953_v8 = vsel %vm734_vm3, %v2612_v7, 0.0 }
 0x36e   : > { %954 = vadd.xlane.f32.xlu1 %v953_v8 }
 0x37f   : > { %962 = vrot.lane.b32.xlu1 %v2839_v25, %s2685_s14 }
 0x380   : > { %960 = vrot.lane.b32.xlu0 %v2843_v26, %s2685_s14 }
 0x383   : > { %1218 = vrot.lane.b32.xlu1 %v2839_v25, %s2686_s17 }
 0x384   : > { %1216 = vrot.lane.b32.xlu0 %v2843_v26, %s2686_s17 }
 0x387   : > { %1212 = vrot.lane.b32.xlu1 %v2843_v26, %s2687_s22 }
 0x388   : > { %1214 = vrot.lane.b32.xlu0 %v2839_v25, %s2687_s22  ;;  %s2691_s22 = smov 40  }
 0x38b   : > { %1504 = vrot.lane.b32.xlu1 %v2839_v25, %s2688_s24 }
 0x38c   : > { %1502 = vrot.lane.b32.xlu0 %v2843_v26, %s2688_s24 }
 0x38f   : > { %1498 = vrot.lane.b32.xlu1 %v2843_v26, %s2689_s28 }
 0x390   : > { %1500 = vrot.lane.b32.xlu0 %v2839_v25, %s2689_s28 }
 0x3e9   : > { %v752_v9 = vpop.xlane.xlu1 %751 }
 0x3ea   : > { %2613 = vrcp.f32 %v752_v9 }
 0x3eb   : > { %v749_v10 = vpop.xlane.xlu0 %748 }
 0x3ec   : > { %2615 = vrcp.f32 %v749_v10 }
 0x3f3   : > { %v952_v11 = vpop.xlane.xlu0 %951 }
 0x3f4   : > { %2617 = vrcp.f32 %v952_v11 }
 0x3f7   : > { %v955_v12 = vpop.xlane.xlu1 %954  ;;  %v2614_v13 = vpop.eup %2613 }
 0x3f8   : > { %2619 = vrcp.f32 %v955_v12  ;;  %v756_v17 = vmul.f32 %v2614_v13, %v2606_v62  ;;  %v961_v18 = vpop.permute.xlu0 %960 }
 0x3f9   : > { %v2616_v14 = vpop.eup %2615 }
 0x3fa   : > { %v754_v15 = vmul.f32 %v2616_v14, %v2608_v1  ;;  %v2329_v1 = vld [vmem:[%s3046_s1 + $0x30] sm:$0xff] }
 0x3fb   : > { %v963_v16 = vpop.permute.xlu1 %962 }
 0x3fc   : > { %2456 = vmatprep.mubr.msk.f32.mxu0 %vm734_vm3, %v754_v15  ;;  %2466 = vmatprep.subr.mxu0 %v963_v16  ;;  %v1217_v33 = vpop.permute.xlu0 %1216 }
 0x3fd   : > { %2457 = vmatmul.mubr.msk.f32.vlgmr.msra.gmra.mxu0 %vm734_vm3, %v756_v17 }
 0x3fe   : > { %2467 = vmatpush3.msra.mxu0 %v963_v16 }
 0x3ff   : > { %2468 = vmatprep.subr.mxu0 %v961_v18  ;;  %v1219_v28 = vpop.permute.xlu1 %1218 }
 0x400   : > { %2469 = vmatpush3.msra.mxu0 %v961_v18  ;;  %v1215_v35 = vpop.permute.xlu0 %1214 }
 0x401   : > { %v2618_v19 = vpop.eup %2617  ;;  %2473 = vmatprep.subr.mxu0 %v639_v23 }
 0x402   : > { %v957_v20 = vmul.f32 %v2618_v19, %v2610_v5 }
 0x403   : > { %v1213_v32 = vpop.permute.xlu1 %1212 }
 0x404   : > { %2470 = vmatprep.mubr.msk.f32.mxu0 %vm734_vm3, %v957_v20  ;;  %v1503_v37 = vpop.permute.xlu0 %1502 }
 0x405   : > { %v2620_v21 = vpop.eup %2619 }
 0x406   : > { %v959_v22 = vmul.f32 %v2620_v21, %v2612_v7 }
 0x407   : > { %v1505_v34 = vpop.permute.xlu1 %1504 }
 0x408   : > { %2471 = vmatmul.mubr.msk.f32.vlgmr.msra.gmra.mxu0 %vm734_vm3, %v959_v22  ;;  %v1501_v38 = vpop.permute.xlu0 %1500 }
 0x409   : > { %2474 = vmatpush3.msra.mxu0 %v639_v23 }
 0x40a   : > { %2478 = vmatprep.subr.mxu0 %v638_v24 }
 0x40b   : > { %v1499_v36 = vpop.permute.xlu1 %1498 }
 0x4bd   : > { %v2458_v27 = vpop.f32.mrf.mxu0 }
 0x4bf   : > { %v835_v29 = vpop.f32.mrf.mxu0 }
 0x4c8   : > { %v2472_v30 = vpop.f32.mrf.mxu0 }
 0x4ca   : > { %v1038_v31 = vpop.f32.mrf.mxu0 }
 0x4cb   : > { %2475 = vmatprep.mubr.msk.f32.mxu0 %vm650_vm2, %v1038_v31 }
 0x4cc   : > { %2476 = vmatmul.mubr.msk.f32.vlgmr.msra.gmra.mxu0 %vm650_vm2, %v2472_v30 }
 0x4cd   : > { %2479 = vmatpush3.msra.mxu0 %v638_v24  ;;  %2480 = vmatprep.mubr.msk.f32.mxu0 %vm650_vm2, %v835_v29  ;;  %v640_v29 = vld [vmem:[%s2792_s20 + $0x10] sm:$0xff] }
 0x4ce   : > { %2483 = vmatprep.subr.msk.mxu0 %vm650_vm2, %v1219_v28 }
 0x4d0   : > { %2481 = vmatmul.mubr.msk.f32.vlgmr.msra.gmra.mxu0 %vm650_vm2, %v2458_v27 }
 0x4d1   : > { %2484 = vmatpush3.xpose.msk.msra.mxu0 %vm650_vm2, %v1219_v28  ;;  %2487 = vmatprep.mubr.msk.f32.mxu0 %vm650_vm2, %v1213_v32 }
 0x4d2   : > { %2485 = vmatprep.subr.msk.mxu0 %vm650_vm2, %v1217_v33 }
 0x4d5   : > { %2486 = vmatpush3.xpose.msk.msra.mxu0 %vm650_vm2, %v1217_v33 }
 0x4d6   : > { %2502 = vmatprep.subr.msk.mxu0 %vm650_vm2, %v1505_v34 }
 0x4d8   : > { %2488 = vmatmul.mubr.msk.f32.vlgmr.msra.gmra.mxu0 %vm650_vm2, %v1215_v35 }
 0x4d9   : > { %2503 = vmatpush3.xpose.msk.msra.mxu0 %vm650_vm2, %v1505_v34  ;;  %2506 = vmatprep.mubr.msk.f32.mxu0 %vm650_vm2, %v1499_v36 }
 0x4da   : > { %2504 = vmatprep.subr.msk.mxu0 %vm650_vm2, %v1503_v37 }
 0x4dd   : > { %2505 = vmatpush3.xpose.msk.msra.mxu0 %vm650_vm2, %v1503_v37 }
 0x4e0   : > { %2507 = vmatmul.mubr.msk.f32.vlgmr.msra.gmra.mxu0 %vm650_vm2, %v1501_v38  ;;  %v641_v38 = vld [vmem:[%s2792_s20 + $0x18] sm:$0xff] }
 0x58c   : > { %v2477_v39 = vpop.f32.mrf.mxu0 }
 0x58e   : > { %v1119_v40 = vpop.f32.mrf.mxu0 }
 0x590   : > { %v2482_v41 = vpop.f32.mrf.mxu0 }
 0x591   : > { %v2917_v42 = vadd.f32 %v2482_v41, %v2477_v39 }
 0x592   : > { %v1200_v43 = vpop.f32.mrf.mxu0 }
 0x593   : > { %v2919_v44 = vadd.f32 %v1200_v43, %v1119_v40 }
 0x598   : > { %v2489_v46 = vpop.f32.mrf.mxu0 }
 0x599   : > { %v1300_v48 = vadd.f32 %v2489_v46, %v2320_v45 }
 0x59a   : > { %v1294_v49 = vpop.f32.mrf.mxu0 }
 0x59b   : > { %v1295_v50 = vadd.f32 %v2319_v47, %v1294_v49  ;;  %v1306_v51 = vsel %vm734_vm3, %v1300_v48, -inf }
 0x59c   : > { %1307 = vmax.xlane.f32.xlu0 %v1306_v51 }
 0x59d   : > { %v1303_v52 = vsel %vm734_vm3, %v1295_v50, -inf }
 0x59e   : > { %1304 = vmax.xlane.f32.xlu1 %v1303_v52 }
 0x5a0   : > { %v2508_v63 = vpop.f32.mrf.mxu0 }
 0x5a1   : > { %v1586_v6 = vadd.f32 %v2508_v63, %v2330_v4 }
 0x5a2   : > { %v1580_v0 = vpop.f32.mrf.mxu0 }
 0x5a3   : > { %v1581_v5 = vadd.f32 %v2329_v1, %v1580_v0  ;;  %v1592_v8 = vsel %vm734_vm3, %v1586_v6, -inf }
 0x5a5   : > { %v1589_v7 = vsel %vm734_vm3, %v1581_v5, -inf }
 0x625   : > { %v1308_v53 = vpop.xlane.xlu0 %1307 }
 0x626   : > { %v1310_v54 = vsub.f32 %v1300_v48, %v1308_v53 }
 0x627   : > { %v1305_v55 = vpop.xlane.xlu1 %1304 }
 0x628   : > { %v1313_v56 = vmul.f32 1.442695, %v1310_v54  ;;  %v1309_v57 = vsub.f32 %v1295_v50, %v1305_v55  ;;  %v1810_v55 = vld [vmem:[%s2801_s29 + $0x10] sm:$0xff] }
 0x62a   : > { %2621 = vpow2.f32 %v1313_v56  ;;  %v1311_v58 = vmul.f32 1.442695, %v1309_v57  ;;  %v1808_v56 = vld [vmem:[%s2801_s29] sm:$0xff]  ;;  %v1902_v57 = vld [vmem:[%s2807_s15 + $0x38] sm:$0xff] }
 0x62c   : > { %2623 = vpow2.f32 %v1311_v58  ;;  %v1901_v58 = vld [vmem:[%s2807_s15 + $0x30] sm:$0xff] }
 0x637   : > { %v2622_v59 = vpop.eup %2621 }
 0x638   : > { %v1318_v60 = vsel %vm734_vm3, %v2622_v59, 0.0 }
 0x639   : > { %v2624_v61 = vpop.eup %2623  ;;  %1319 = vadd.xlane.f32.xlu1 %v1318_v60  ;;  %v1899_v60 = vld [vmem:[%s2807_s15 + $0x20] sm:$0xff] }
 0x63a   : > { %v1315_v62 = vsel %vm734_vm3, %v2624_v61, 0.0 }
 0x63b   : > { %1316 = vadd.xlane.f32.xlu0 %v1315_v62 }
 0x64a   : > { %1325 = vrot.lane.b32.xlu1 %v2843_v26, %s2690_s13 }
 0x651   : > { %1327 = vrot.lane.b32.xlu0 %v2839_v25, %s2690_s13 }
 0x66e   : > { %1590 = vmax.xlane.f32.xlu1 %v1589_v7 }
 0x670   : > { %1593 = vmax.xlane.f32.xlu0 %v1592_v8 }
 0x6c2   : > { %v1320_v9 = vpop.xlane.xlu1 %1319 }
 0x6c3   : > { %2625 = vrcp.f32 %v1320_v9  ;;  %v2339_v9 = vld [vmem:[%s504_s23] ss:$0 sm:$0xff] }
 0x6c4   : > { %v1317_v10 = vpop.xlane.xlu0 %1316 }
 0x6c5   : > { %2627 = vrcp.f32 %v1317_v10 }
 0x6c6   : > { %v1326_v12 = vpop.permute.xlu1 %1325 }
 0x6c8   : > { %v1328_v11 = vpop.permute.xlu0 %1327 }
 0x6c9   : > { %2490 = vmatprep.subr.mxu1 %v1328_v11 }
 0x6ca   : > { %2491 = vmatpush3.msra.mxu1 %v1328_v11 }
 0x6cb   : > { %2492 = vmatprep.subr.mxu1 %v1326_v12 }
 0x6cc   : > { %2493 = vmatpush3.msra.mxu1 %v1326_v12 }
 0x6cd   : > { %2497 = vmatprep.subr.mxu1 %v640_v29 }
 0x6d0   : > { %v2626_v13 = vpop.eup %2625 }
 0x6d1   : > { %v1324_v16 = vmul.f32 %v2626_v13, %v2622_v59  ;;  %v1900_v59 = vld [vmem:[%s2807_s15 + $0x28] sm:$0xff]  ;;  %v1897_v13 = vld [vmem:[%s2807_s15 + $0x10] sm:$0xff] }
 0x6d2   : > { %v2628_v14 = vpop.eup %2627 }
 0x6d3   : > { %v1322_v15 = vmul.f32 %v2628_v14, %v2624_v61  ;;  %v1898_v61 = vld [vmem:[%s2807_s15 + $0x18] sm:$0xff]  ;;  %v1896_v14 = vld [vmem:[%s2807_s15 + $0x8] sm:$0xff] }
 0x6d5   : > { %2494 = vmatprep.mubr.msk.f32.mxu1 %vm734_vm3, %v1322_v15  ;;  %v1895_v15 = vld [vmem:[%s2807_s15] sm:$0xff] }
 0x6d6   : > { %2495 = vmatmul.mubr.msk.f32.vlgmr.msra.gmra.mxu1 %vm734_vm3, %v1324_v16 }
 0x6d7   : > { %2498 = vmatpush3.msra.mxu1 %v640_v29 }
 0x6f7   : > { %v1591_v17 = vpop.xlane.xlu1 %1590 }
 0x6f8   : > { %v1595_v18 = vsub.f32 %v1581_v5, %v1591_v17 }
 0x6f9   : > { %v1594_v19 = vpop.xlane.xlu0 %1593 }
 0x6fa   : > { %v1597_v20 = vmul.f32 1.442695, %v1595_v18  ;;  %v1596_v21 = vsub.f32 %v1586_v6, %v1594_v19 }
 0x6fc   : > { %2629 = vpow2.f32 %v1597_v20  ;;  %v1599_v22 = vmul.f32 1.442695, %v1596_v21 }
 0x6fe   : > { %2631 = vpow2.f32 %v1599_v22 }
 0x709   : > { %v2630_v23 = vpop.eup %2629 }
 0x70a   : > { %v1601_v24 = vsel %vm734_vm3, %v2630_v23, 0.0 }
 0x70b   : > { %v2632_v27 = vpop.eup %2631  ;;  %1602 = vadd.xlane.f32.xlu0 %v1601_v24 }
 0x70c   : > { %v1604_v28 = vsel %vm734_vm3, %v2632_v27, 0.0 }
 0x70d   : > { %1605 = vadd.xlane.f32.xlu1 %v1604_v28 }
 0x71e   : > { %1611 = vrot.lane.b32.xlu1 %v2843_v26, %s2691_s22 }
 0x721   : > { %1613 = vrot.lane.b32.xlu0 %v2839_v25, %s2691_s22 }
 0x794   : > { %v1603_v30 = vpop.xlane.xlu0 %1602 }
 0x795   : > { %2633 = vrcp.f32 %v1603_v30 }
 0x796   : > { %v2496_v31 = vpop.f32.mrf.mxu1  ;;  %v1606_v32 = vpop.xlane.xlu1 %1605 }
 0x797   : > { %2635 = vrcp.f32 %v1606_v32 }
 0x798   : > { %v1403_v33 = vpop.f32.mrf.mxu1  ;;  %v1614_v34 = vpop.permute.xlu0 %1613 }
 0x799   : > { %2499 = vmatprep.mubr.msk.f32.mxu1 %vm650_vm2, %v1403_v33  ;;  %2509 = vmatprep.subr.mxu1 %v1614_v34 }
 0x79a   : > { %2500 = vmatmul.mubr.msk.f32.vlgmr.msra.gmra.mxu1 %vm650_vm2, %v2496_v31  ;;  %v1612_v35 = vpop.permute.xlu1 %1611 }
 0x79b   : > { %2510 = vmatpush3.msra.mxu1 %v1614_v34 }
 0x79c   : > { %2511 = vmatprep.subr.mxu1 %v1612_v35 }
 0x79d   : > { %2512 = vmatpush3.msra.mxu1 %v1612_v35 }
 0x79e   : > { %2516 = vmatprep.subr.mxu1 %v641_v38 }
 0x7a2   : > { %v2634_v26 = vpop.eup %2633 }
 0x7a3   : > { %v1608_v36 = vmul.f32 %v2634_v26, %v2630_v23 }
 0x7a4   : > { %v2636_v25 = vpop.eup %2635 }
 0x7a5   : > { %2513 = vmatprep.mubr.msk.f32.mxu1 %vm734_vm3, %v1608_v36  ;;  %v1610_v37 = vmul.f32 %v2636_v25, %v2632_v27 }
 0x7a7   : > { %2514 = vmatmul.mubr.msk.f32.vlgmr.msra.gmra.mxu1 %vm734_vm3, %v1610_v37 }
 0x7a8   : > { %2517 = vmatpush3.msra.mxu1 %v641_v38 }
 0x7a9   : > { %2532 = vmatprep.subr.mxu1 %v1902_v57 }
 0x85a   : > { %v2501_v39 = vpop.f32.mrf.mxu1 }
 0x85b   : > { %v1494_v40 = vadd.f32 %v2501_v39, %v2917_v42 }
 0x85c   : > { %v1484_v41 = vpop.f32.mrf.mxu1 }
 0x85d   : > { %v1493_v43 = vadd.f32 %v1484_v41, %v2919_v44 }
 0x867   : > { %v2515_v45 = vpop.f32.mrf.mxu1 }
 0x869   : > { %v1689_v46 = vpop.f32.mrf.mxu1 }
 0x86a   : > { %2518 = vmatprep.mubr.msk.f32.mxu1 %vm650_vm2, %v1689_v46 }
 0x86b   : > { %2519 = vmatmul.mubr.msk.f32.vlgmr.msra.gmra.mxu1 %vm650_vm2, %v2515_v45 }
 0x86c   : > { %2533 = vmatpush3.msra.mxu1 %v1902_v57 }
 0x86d   : > { %2534 = vmatprep.subr.mxu1 %v1901_v58 }
 0x86e   : > { %2535 = vmatpush3.msra.mxu1 %v1901_v58 }
 0x86f   : > { %2536 = vmatprep.subr.mxu1 %v1900_v59 }
 0x870   : > { %2537 = vmatpush3.msra.mxu1 %v1900_v59 }
 0x871   : > { %2538 = vmatprep.subr.mxu1 %v1899_v60 }
 0x872   : > { %2539 = vmatpush3.msra.mxu1 %v1899_v60 }
 0x873   : > { %2540 = vmatprep.subr.mxu1 %v1898_v61 }
 0x874   : > { %2541 = vmatpush3.msra.mxu1 %v1898_v61 }
 0x875   : > { %2542 = vmatprep.subr.mxu1 %v1897_v13 }
 0x876   : > { %2543 = vmatpush3.msra.mxu1 %v1897_v13 }
 0x877   : > { %2544 = vmatprep.subr.mxu1 %v1896_v14 }
 0x878   : > { %2545 = vmatpush3.msra.mxu1 %v1896_v14 }
 0x879   : > { %2546 = vmatprep.subr.mxu1 %v1895_v15 }
 0x87a   : > { %2547 = vmatpush3.msra.mxu1 %v1895_v15 }
 0x92b   : > { %v2520_v47 = vpop.f32.mrf.mxu1 }
 0x92c   : > { %v1780_v48 = vadd.f32 %v2520_v47, %v1494_v40 }
 0x92d   : > { %v1770_v49 = vpop.f32.mrf.mxu1 }
 0x92e   : > { %v2958_v50 = vadd.f32 %v1780_v48, %v2818_v3  ;;  %v1779_v42 = vadd.f32 %v1770_v49, %v1493_v43  ;;  %v1811_v3 = vld [vmem:[%s2801_s29 + $0x18] sm:$0xff] }
 0x92f   : > { %2521 = vmatprep.subr.mxu0 %v1811_v3 }
 0x930   : > { %v2961_v51 = vadd.f32 %v1779_v42, %v2816_v2  ;;  %v1785_v44 = vmul.f32 %v2958_v50, %v2958_v50  ;;  %2522 = vmatpush3.msra.mxu0 %v1811_v3  ;;  %v1809_v2 = vld [vmem:[%s2801_s29 + $0x8] sm:$0xff] }
 0x931   : > { %2523 = vmatprep.subr.mxu0 %v1810_v55 }
 0x932   : > { %v1789_v52 = vsel %vm529_vm1, %v1785_v44, 0.0  ;;  %v1784_v53 = vmul.f32 %v2961_v51, %v2961_v51  ;;  %2524 = vmatpush3.msra.mxu0 %v1810_v55 }
 0x933   : > { %1790 = vadd.xlane.f32.xlu0 %v1789_v52  ;;  %2525 = vmatprep.subr.mxu0 %v1809_v2 }
 0x934   : > { %v1786_v54 = vsel %vm529_vm1, %v1784_v53, 0.0  ;;  %2526 = vmatpush3.msra.mxu0 %v1809_v2 }
 0x935   : > { %1787 = vadd.xlane.f32.xlu1 %v1786_v54  ;;  %2527 = vmatprep.subr.mxu0 %v1808_v56 }
 0x936   : > { %2528 = vmatpush3.msra.mxu0 %v1808_v56 }
 0x9bc   : > { %v1791_v62 = vpop.xlane.xlu0 %1790 }
 0x9bd   : > { %v1793_v63 = vmul.f32 0.03125, %v1791_v62 }
 0x9be   : > { %v1788_v0 = vpop.xlane.xlu1 %1787 }
 0x9bf   : > { %v1795_v1 = vadd.f32 1e-06, %v1793_v63  ;;  %v1792_v4 = vmul.f32 0.03125, %v1788_v0 }
 0x9c1   : > { %2637 = vrsqrt.f32 %v1795_v1  ;;  %v1794_v5 = vadd.f32 1e-06, %v1792_v4 }
 0x9c3   : > { %2639 = vrsqrt.f32 %v1794_v5 }
 0x9ce   : > { %v2638_v6 = vpop.eup %2637 }
 0x9cf   : > { %v1799_v8 = vmul.f32 %v2638_v6, %v2958_v50 }
 0x9d0   : > { %v2640_v7 = vpop.eup %2639 }
 0x9d1   : > { %v1798_v10 = vmul.f32 %v2640_v7, %v2961_v51  ;;  %v1807_v12 = vmul.f32 %v2339_v9, %v1799_v8 }
 0x9d3   : > { %v1806_v11 = vmul.f32 %v2339_v9, %v1798_v10 }
 0x9d5   : > { %2529 = vmatprep.mubr.msk.f32.mxu0 %vm529_vm1, %v1806_v11 }
 0x9d6   : > { %2530 = vmatmul.mubr.msk.f32.vlgmr.msra.gmra.mxu0 %vm529_vm1, %v1807_v12 }
 0xa96   : > { %v2531_v16 = vpop.f32.mrf.mxu0 }
 0xa97   : > { %v1894_v19 = vmax.f32 %v2531_v16, 0.0 }
 0xa98   : > { %v1884_v17 = vpop.f32.mrf.mxu0 }
 0xa99   : > { %v1893_v18 = vmax.f32 %v1884_v17, 0.0 }
 0xa9b   : > { %2548 = vmatprep.mubr.msk.f32.mxu1 %vm1903_vm4, %v1893_v18 }
 0xa9c   : > { %2549 = vmatmul.mubr.msk.f32.vlgmr.msra.gmra.mxu1 %vm1903_vm4, %v1894_v19 }
 0xb5c   : > { %v2550_v20 = vpop.f32.mrf.mxu1 }
 0xb5d   : > { %v1986_v21 = vadd.f32 %v2550_v20, %v2958_v50  ;;  %1992 = sbr.rel (%p2344_p5) target bundleno = 3485 (0xd9d), region = 80 }
 0xb5e   : > { %v1976_v22 = vpop.f32.mrf.mxu1 }
 0xb5f   : > { %1988 = vst.msk [vmem:[#allocation2 + $0x8] sm:$0xff] %vm529_vm1, %v1986_v21  ;;  %v1985_v23 = vadd.f32 %v1976_v22, %v2961_v51 }
 0xb61   : > { %1987 = vst.msk [vmem:[#allocation2] sm:$0xff] %vm529_vm1, %v1985_v23 }
 0xb62   : > { %v1994_v24 = vrot.slane %v1986_v21, 7  ;;  %vm1996_vm5 = vcmask 1040384   ;;  %vm2000_vm6 = vcmask 254976   ;;  %v2018_v30 = vld [vmem:[%s3054_s9 + $0x18] sm:$0xff]  ;;  %v2692_v31 = vmov 0.0   ;;  %v2017_v32 = vld [vmem:[%s3054_s9 + $0x10] sm:$0xff] }
 0xb63   : > { %2551 = vmatprep.subr.mxu0 %v2692_v31  ;;  %vm2693_vm7 = vmmov 0   ;;  %2562 = vmatprep.subr.mxu1 %v2692_v31  ;;  %v2016_v33 = vld [vmem:[%s3054_s9 + $0x8] sm:$0xff]  ;;  %v2015_v34 = vld [vmem:[%s3054_s9] sm:$0xff]  ;;  %v2103_v40 = vld [vmem:[%s3056_s11 + $0x18] sm:$0xff] }
 0xb64   : > { %v1997_v27 = vsel %vm1996_vm5, %v1985_v23, %v1994_v24  ;;  %2559 = vmatprep.mubr.msk.f32.mxu0 %vm2693_vm7, %v2692_v31  ;;  %2552 = vmatpush3.msra.mxu0 %v2018_v30  ;;  %v2345_v37 = vld [vmem:[%s3053_s8] ss:$0 sm:$0xff]  ;;  %v2102_v41 = vld [vmem:[%s3056_s11 + $0x10] sm:$0xff]  ;;  %v2101_v43 = vld [vmem:[%s3056_s11 + $0x8] sm:$0xff] }
 0xb65   : > { %v1999_v28 = vmul.f32 %v1997_v27, %v1997_v27  ;;  %2553 = vmatprep.subr.mxu0 %v2692_v31  ;;  %2570 = vmatprep.mubr.msk.f32.mxu1 %vm2693_vm7, %v2692_v31  ;;  %v2100_v45 = vld [vmem:[%s3056_s11] sm:$0xff] }
 0xb66   : > { %2554 = vmatpush3.msra.mxu0 %v2017_v32  ;;  %2563 = vmatpush3.msra.mxu1 %v2103_v40  ;;  %v2346_v46 = vld [vmem:[%s3055_s10] ss:$0 sm:$0xff] }
 0xb67   : > { %v2001_v29 = vsel %vm2000_vm6, %v1999_v28, 0.0  ;;  %2555 = vmatprep.subr.mxu0 %v2692_v31  ;;  %2564 = vmatprep.subr.mxu1 %v2692_v31  ;;  %v2348_v42 = vld [vmem:[%s3057_s12] ss:$0 sm:$0xff] }
 0xb68   : > { %2002 = vadd.xlane.f32.xlu0 %v2001_v29  ;;  %2556 = vmatpush3.msra.mxu0 %v2016_v33 }
 0xb69   : > { %2557 = vmatprep.subr.mxu0 %v2692_v31  ;;  %2565 = vmatpush3.msra.mxu1 %v2102_v41 }
 0xb6a   : > { %2558 = vmatpush3.msra.mxu0 %v2015_v34  ;;  %2566 = vmatprep.subr.mxu1 %v2692_v31 }
 0xb6b   : > { %2567 = vmatpush3.msra.mxu1 %v2101_v43 }
 0xb6c   : > { %2568 = vmatprep.subr.mxu1 %v2692_v31 }
 0xb6d   : > { %2569 = vmatpush3.msra.mxu1 %v2100_v45 }
 0xbf1   : > { %v2003_v35 = vpop.xlane.xlu0 %2002 }
 0xbf2   : > { %v2004_v26 = vmul.f32 0.03125, %v2003_v35 }
 0xbf4   : > { %v2005_v36 = vadd.f32 1e-06, %v2004_v26 }
 0xbf6   : > { %2641 = vrsqrt.f32 %v2005_v36 }
 0xc03   : > { %v2642_v25 = vpop.eup %2641 }
 0xc04   : > { %v2007_v38 = vmul.f32 %v2642_v25, %v1997_v27 }
 0xc06   : > { %v2014_v39 = vmul.f32 %v2345_v37, %v2007_v38 }
 0xc08   : > { %2560 = vmatmul.mubr.msk.f32.vlgmr.msra.gmra.mxu0 %vm529_vm1, %v2014_v39 }
 0xcc8   : > { %v2095_v47 = vpop.f32.mrf.mxu0 }
 0xcc9   : > { %v2096_v48 = vadd.f32 %v2346_v46, %v2095_v47 }
 0xcca   : > { %v2561_v49 = vpop.f32.mrf.mxu0 }
 0xccb   : > { %2643 = vtanh.f32 %v2096_v48 }
 0xcd8   : > { %v2644_v50 = vpop.eup %2643 }
 0xcd9   : > { %2571 = vmatmul.mubr.msk.f32.vlgmr.msra.gmra.mxu1 %vm529_vm1, %v2644_v50 }
 0xd99   : > { %v2180_v51 = vpop.f32.mrf.mxu1 }
 0xd9a   : > { %v2181_v44 = vadd.f32 %v2348_v42, %v2180_v51 }
 0xd9b   : > { %v2572_v52 = vpop.f32.mrf.mxu1 }
 0xd9c   : > { %2184 = vst [vmem:[#allocation3] sm:$0x3] %v2181_v44 }
 0xd9d PF: > { %p2577_p6 = scmp.eq.s32.totalorder %s2771_s26, 1  ;;  %s2694_s16 = smov [#allocation3]  }
 0xd9e   : > { %s2192_s18 = sshll.u32 %s2694_s16, 4  ;;  %s2193_s18 = int_to_ptr.vmem [resolvable:$true] %s2192_s18 }
 0xd9f   : > { %s2645_s19 = scalar_lea.vmem %s2193_s18, 32  ;;  %p2652_p10 = scmp.lt.s32.totalorder %s2193_s18, %s2193_s18 }
 0xda0   : > { %p2646_p7 = scmp.ne.s32.totalorder %s2193_s18, %s2645_s19  ;;  %p2653_p11 = scmp.lt.s32.totalorder %s2645_s19, %s2645_s19 }
 0xda2   : > { %p2647_p8 = pnand %p2646_p7, %p2577_p6  ;;  %p2654_p12 = por %p2653_p11, %p2652_p10 }
 0xda4   : > { %p2648_p9 = pneg %p2647_p8 }
 0xda6   : > { %p2655_p13 = pnand %p2654_p12, %p2648_p9 }
 0xda8   : > { %2658 = shalt.err (!%p2655_p13)
}
 0xda9   : > { %s3063_s25 = sld [smem:[#allocation7_spill]] }
 0xdaf   : > { %2574 = dma.vmem_to_hbm [thread:$0]  (%p2577_p6), %s2193_s18, 32, %s3063_s25, [#allocation4]  }
 0xdb0   : > { %2674 = dma.done.wait (%p2577_p6), [#allocation4], 32  }
 0xdb1   : > { %2676 = vsyncadd (%p2577_p6), [#allocation4], 4294967264 }
 0xdb2 PF: > { %s3064_s30 = sld [smem:[#allocation6_spill]] }
 0xdb8   : > { %s24_s25 = sadd.s32 1, %s3064_s30  }
 0xdb9   : > { %p21_p0 = scmp.ge.s32.totalorder %s24_s25, 4  }
 0xdbb   :  { %23 = sbr.rel (!%p21_p0) target bundleno = 3 (0x3), region = 125 }
 0xdc0   :  { %2205 = vsyncpa [#allocation4], 1 }
 0xdc1   :  { %2207 = vsyncpa [#allocation4 + $0x1], 1 }

</bundles_post_ra>
